<compile_context>
chip_gen: v7x
topology: tpu7x:2x2x1
jax: 0.10.0
libtpu: 0.0.40
codegen_flags: <defaults>
</compile_context>

<pallas_src>
import functools

import jax
import jax.numpy as jnp
import numpy as np
from jax.experimental import pallas as pl
from jax.experimental.pallas import tpu as pltpu

EPS = 1e-5           # PyTorch BatchNorm1d default eps
SA_K = 7             # SpatialAttention kernel size
SA_PAD = (SA_K - 1) // 2


def _sigmoid(v):
    """sigmoid via EUP exp + approx reciprocal + one Newton step (f32-accurate)."""
    d = 1.0 + jnp.exp(-v)
    r = pl.reciprocal(d, approx=True)
    return r * (2.0 - d * r)


def residual_block_kernel(*refs, bb, seg_len, has_downsample):
    """One grid step processes `bb` batch elements packed along lanes.

    x_ref   : (C_in, bb*L)      VMEM   lanes = [batch0 | batch1 | ...]
    w1_ref  : (C_out, 3*C_in)   conv1 weights (BN1 folded, im2col tap-stacked)
    w2_ref  : (C_out, 3*C_out)  conv2 weights (BN2 folded, im2col tap-stacked)
    bias_ref: (C_out, 3)        columns [b1, b2, bd]
    fc1_ref : (H, C_out)        channel-attention FC1 (no bias)
    fc2_ref : (C_out, H)        channel-attention FC2 (no bias)
    wd_ref  : (C_out, C_in)     downsample 1x1 conv (only when has_downsample)
    sa_ref  : (2, 8)    SMEM    [:, :7] taps (row 0 pre-scaled by 1/C_out), [0,7] bias
    o_ref   : (C_out, bb*L)
    """
    if has_downsample:
        (x_ref, w1_ref, w2_ref, bias_ref, fc1_ref, fc2_ref,
         wd_ref, sa_ref, o_ref) = refs
    else:
        (x_ref, w1_ref, w2_ref, bias_ref, fc1_ref, fc2_ref,
         sa_ref, o_ref) = refs
        wd_ref = None

    C_in, N = x_ref.shape
    C_out = o_ref.shape[0]
    L = seg_len

    # ---- per-segment edge masks for offsets -3..3, built once and reused by
    #      conv1 / conv2 / spatial attention.
    lane = jax.lax.broadcasted_iota(jnp.int32, (1, N), 1)
    pos = (lane % L) if bb > 1 else lane
    masks = {}
    for off in range(-SA_PAD, SA_PAD + 1):
        if off != 0:
            masks[off] = jnp.logical_and(pos + off >= 0, pos + off < L)

    def shift(v, off):
        """out[:, l] = v[:, l + off] within each length-L batch segment, else 0."""
        if off == 0:
            return v
        rolled = pltpu.roll(v, shift=(-off) % N, axis=1)
        return jnp.where(masks[off], rolled, 0.0)

    x = x_ref[...].astype(jnp.float32)                        # (C_in, N)
    b1 = bias_ref[:, 0:1]
    b2 = bias_ref[:, 1:2]

    # ---- conv1 (k=3, pad=1) + folded BN1 + ReLU : ONE matmul, K = 3*C_in
    xs = jnp.concatenate([shift(x, -1), x, shift(x, 1)], axis=0)      # (3*C_in, N)
    h1 = jnp.maximum(
        jnp.dot(w1_ref[...], xs, preferred_element_type=jnp.float32) + b1, 0.0)

    # ---- conv2 (k=3, pad=1) + folded BN2 : ONE matmul, K = 3*C_out
    hs = jnp.concatenate([shift(h1, -1), h1, shift(h1, 1)], axis=0)   # (3*C_out, N)
    out = jnp.dot(w2_ref[...], hs, preferred_element_type=jnp.float32) + b2

    # ---- ChannelAttention: per-segment avg/max over L -> shared MLP -> sigmoid
    cols = []
    for b in range(bb):
        seg = out[:, b * L:(b + 1) * L] if bb > 1 else out
        cols.append(jnp.mean(seg, axis=1, keepdims=True))
        cols.append(jnp.max(seg, axis=1, keepdims=True))
    stats = jnp.concatenate(cols, axis=1)                              # (C_out, 2*bb)
    hid = jnp.maximum(
        jnp.dot(fc1_ref[...], stats, preferred_element_type=jnp.float32), 0.0)
    logits = jnp.dot(fc2_ref[...], hid, preferred_element_type=jnp.float32)
    ca_cols = []
    for b in range(bb):
        ca_b = _sigmoid(logits[:, 2 * b:2 * b + 1] + logits[:, 2 * b + 1:2 * b + 2])
        ca_cols.append(jnp.broadcast_to(ca_b, (C_out, L)))
    ca = jnp.concatenate(ca_cols, axis=1) if bb > 1 else ca_cols[0]    # (C_out, N)
    out = out * ca

    # ---- SpatialAttention: channel sum+max stacked -> ONE roll per tap -> sigmoid
    # (1/C_out of the channel mean is folded into sa_ref row 0 by the wrapper.)
    s_sum = jnp.sum(out, axis=0, keepdims=True)                        # (1, N)
    s_max = jnp.max(out, axis=0, keepdims=True)                        # (1, N)
    feat = jnp.concatenate([s_sum, s_max], axis=0)                     # (2, N)
    sacc = jnp.full((1, N), sa_ref[0, SA_K], jnp.float32)              # bias
    for k in range(SA_K):
        off = k - SA_PAD
        r = shift(feat, off)                                           # one roll/tap
        sacc = sacc + sa_ref[0, k] * r[0:1, :] + sa_ref[1, k] * r[1:2, :]
    out = out * _sigmoid(sacc)

    # ---- residual (downsample folded to a 1x1 matmul, or identity) + ReLU
    if has_downsample:
        res = (jnp.dot(wd_ref[...], x, preferred_element_type=jnp.float32)
               + bias_ref[:, 2:3])
    else:
        res = x
    o_ref[...] = jnp.maximum(out + res, 0.0).astype(o_ref.dtype)


def _fold_bn_conv(w, b, gamma, beta, mean, var):
    """Fold inference-mode BatchNorm1d into the preceding Conv1d weights/bias."""
    scale = gamma / jnp.sqrt(var + EPS)                     # (C_out,)
    return w * scale[:, None, None], (b - mean) * scale + beta


def _im2col_weights(w):
    """(C_out, C_in, K) -> (C_out, K*C_in), tap-major along the contraction."""
    C_out, C_in, K = w.shape
    return jnp.transpose(w, (0, 2, 1)).reshape(C_out, K * C_in)


def _pick_bb(B, L):
    """Batch elements lane-packed per grid step (matmul N = bb*L lanes)."""
    if L % 128 != 0:
        return 1                       # keep per-segment lane slices aligned
    target = max(1, 512 // L)          # aim for 256-512 lanes per matmul
    for cand in range(min(B, target), 0, -1):
        if B % cand == 0:
            return cand
    return 1


def residual_block_forward(x, p):
    """x: (B, C_in, L) float32.  p: dict of raw (unfolded) module parameters."""
    B, C_in, L = x.shape
    C_out = p["w1"].shape[0]
    H = p["fc1"].shape[0]
    has_downsample = p.get("wd") is not None
    if not has_downsample:
        assert C_in == C_out, "identity residual requires in_channels == out_channels"

    # --- weight preparation (pure JAX, outside the kernel) ---
    w1f, b1f = _fold_bn_conv(p["w1"], p["b1"], p["g1"], p["be1"], p["m1"], p["v1"])
    w2f, b2f = _fold_bn_conv(p["w2"], p["b2"], p["g2"], p["be2"], p["m2"], p["v2"])
    w1k = _im2col_weights(w1f).astype(jnp.float32)            # (C_out, 3*C_in)
    w2k = _im2col_weights(w2f).astype(jnp.float32)            # (C_out, 3*C_out)

    if has_downsample:
        wdf, bdf = _fold_bn_conv(p["wd"], p["bd"], p["gd"], p["bed"], p["md"], p["vd"])
        wdk = wdf[:, :, 0].astype(jnp.float32)                # (C_out, C_in)
    else:
        wdk = None
        bdf = jnp.zeros((C_out,), jnp.float32)

    bias_pack = jnp.stack([b1f, b2f, bdf], axis=1).astype(jnp.float32)  # (C_out, 3)

    # SA taps + bias in one SMEM operand; fold the 1/C of the channel mean into
    # row 0 of the 7 taps.
    sa_pack = jnp.zeros((2, SA_K + 1), jnp.float32)
    sa_pack = sa_pack.at[:, :SA_K].set(p["sa_w"].reshape(2, SA_K).astype(jnp.float32))
    sa_pack = sa_pack.at[0, :SA_K].multiply(1.0 / C_out)
    sa_pack = sa_pack.at[0, SA_K].set(p["sa_b"].astype(jnp.float32)[0])

    # --- batch lane-packing: bb elements per grid step, lanes = [b0 | b1 | ...] ---
    bb = _pick_bb(B, L)
    G = B // bb
    N = bb * L
    xk = (x.reshape(G, bb, C_in, L).transpose(0, 2, 1, 3).reshape(G, C_in, N)
          if bb > 1 else x)

    kernel = functools.partial(residual_block_kernel, bb=bb, seg_len=L,
                               has_downsample=has_downsample)

    in_specs = [
        pl.BlockSpec((None, C_in, N), lambda g: (g, 0, 0)),       # x (bb batch tile)
        pl.BlockSpec((C_out, 3 * C_in), lambda g: (0, 0)),        # conv1 (folded)
        pl.BlockSpec((C_out, 3 * C_out), lambda g: (0, 0)),       # conv2 (folded)
        pl.BlockSpec((C_out, 3), lambda g: (0, 0)),               # [b1, b2, bd]
        pl.BlockSpec((H, C_out), lambda g: (0, 0)),               # CA fc1
        pl.BlockSpec((C_out, H), lambda g: (0, 0)),               # CA fc2
    ]
    args = [xk, w1k, w2k, bias_pack,
            p["fc1"].astype(jnp.float32), p["fc2"].astype(jnp.float32)]
    if has_downsample:
        in_specs.append(pl.BlockSpec((C_out, C_in), lambda g: (0, 0)))  # downsample
        args.append(wdk)
    in_specs.append(pl.BlockSpec(memory_space=pltpu.MemorySpace.SMEM))  # SA taps+bias
    args.append(sa_pack)

    out = pl.pallas_call(
        kernel,
        out_shape=jax.ShapeDtypeStruct((G, C_out, N), x.dtype),
        grid=(G,),
        in_specs=in_specs,
        out_specs=pl.BlockSpec((None, C_out, N), lambda g: (g, 0, 0)),
        compiler_params=pltpu.CompilerParams(
            dimension_semantics=("parallel",),    # shard batch groups over TCs
            vmem_limit_bytes=32 * 1024 * 1024,
        ),
    )(*args)

    if bb > 1:
        out = out.reshape(G, C_out, bb, L).transpose(0, 2, 1, 3).reshape(B, C_out, L)
    return out


def _reference(x, p):
    """Pure-JAX reference of ResidualBlock.forward (inference-mode BN)."""
    hi = jax.lax.Precision.HIGHEST

    def conv1d(v, w, b, pad):
        y = jax.lax.conv_general_dilated(
            v, w, window_strides=(1,), padding=((pad, pad),),
            dimension_numbers=("NCH", "OIH", "NCH"), precision=hi)
        return y + b[None, :, None]

    def bn(v, g, be, m, s2):
        return ((v - m[None, :, None]) / jnp.sqrt(s2[None, :, None] + EPS)
                * g[None, :, None] + be[None, :, None])

    out = jax.nn.relu(bn(conv1d(x, p["w1"], p["b1"], 1),
                         p["g1"], p["be1"], p["m1"], p["v1"]))
    out = bn(conv1d(out, p["w2"], p["b2"], 1),
             p["g2"], p["be2"], p["m2"], p["v2"])

    # Channel attention
    avg = jnp.mean(out, axis=-1)
    mx = jnp.max(out, axis=-1)
    mlp = lambda v: jnp.matmul(jax.nn.relu(jnp.matmul(v, p["fc1"].T, precision=hi)),
                               p["fc2"].T, precision=hi)
    ca = jax.nn.sigmoid(mlp(avg) + mlp(mx))[:, :, None]
    out = ca * out

    # Spatial attention
    feat = jnp.stack([jnp.mean(out, axis=1), jnp.max(out, axis=1)], axis=1)
    sa = jax.nn.sigmoid(conv1d(feat, p["sa_w"], p["sa_b"], SA_PAD))
    out = sa * out

    # Residual (downsample or identity)
    if p.get("wd") is not None:
        res = bn(conv1d(x, p["wd"], p["bd"], 0),
                 p["gd"], p["bed"], p["md"], p["vd"])
    else:
        res = x
    return jax.nn.relu(out + res)


def _make_params(key, C_in, C_out, H, with_downsample):
    ks = jax.random.split(key, 24)
    u = lambda k, shape, bound: jax.random.uniform(k, shape, jnp.float32, -bound, bound)
    p = {}
    p["w1"] = u(ks[1], (C_out, C_in, 3), 1.0 / np.sqrt(C_in * 3))
    p["b1"] = u(ks[2], (C_out,), 1.0 / np.sqrt(C_in * 3))
    p["g1"] = jax.random.uniform(ks[3], (C_out,), jnp.float32, 0.5, 1.5)
    p["be1"] = u(ks[4], (C_out,), 0.5)
    p["m1"] = 0.1 * jax.random.normal(ks[5], (C_out,), jnp.float32)
    p["v1"] = jax.random.uniform(ks[6], (C_out,), jnp.float32, 0.5, 1.5)
    p["w2"] = u(ks[7], (C_out, C_out, 3), 1.0 / np.sqrt(C_out * 3))
    p["b2"] = u(ks[8], (C_out,), 1.0 / np.sqrt(C_out * 3))
    p["g2"] = jax.random.uniform(ks[9], (C_out,), jnp.float32, 0.5, 1.5)
    p["be2"] = u(ks[10], (C_out,), 0.5)
    p["m2"] = 0.1 * jax.random.normal(ks[11], (C_out,), jnp.float32)
    p["v2"] = jax.random.uniform(ks[12], (C_out,), jnp.float32, 0.5, 1.5)
    p["fc1"] = u(ks[13], (H, C_out), 1.0 / np.sqrt(C_out))
    p["fc2"] = u(ks[14], (C_out, H), 1.0 / np.sqrt(H))
    p["sa_w"] = u(ks[15], (1, 2, SA_K), 1.0 / np.sqrt(2 * SA_K))
    p["sa_b"] = u(ks[16], (1,), 1.0 / np.sqrt(2 * SA_K))
    if with_downsample:
        p["wd"] = u(ks[17], (C_out, C_in, 1), 1.0 / np.sqrt(C_in))
        p["bd"] = u(ks[18], (C_out,), 1.0 / np.sqrt(C_in))
        p["gd"] = jax.random.uniform(ks[19], (C_out,), jnp.float32, 0.5, 1.5)
        p["bed"] = u(ks[20], (C_out,), 0.5)
        p["md"] = 0.1 * jax.random.normal(ks[21], (C_out,), jnp.float32)
        p["vd"] = jax.random.uniform(ks[22], (C_out,), jnp.float32, 0.5, 1.5)
    return p


if __name__ == "__main__":
    B, L = 2, 128
    key = jax.random.PRNGKey(0)
    k_x1, k_p1, k_x2, k_p2 = jax.random.split(key, 4)

    # Case 1: in_channels != out_channels -> downsample (1x1 conv + BN) residual.
    # out_channels >= 16 so ChannelAttention's reduction (ratio 16) has H >= 1.
    C_in, C_out = 8, 32
    x1 = jax.random.normal(k_x1, (B, C_in, L), jnp.float32)
    p1 = _make_params(k_p1, C_in, C_out, C_out // 16, with_downsample=True)
    out1 = jax.block_until_ready(residual_block_forward(x1, p1))
    ref1 = jax.block_until_ready(_reference(x1, p1))
    np.testing.assert_allclose(np.asarray(out1), np.asarray(ref1), rtol=1e-4, atol=1e-4)

    # Case 2: in_channels == out_channels -> identity residual (downsample skipped
    # statically: no wd matmul, no wd/bd DMA stream).
    C2 = 32
    x2 = jax.random.normal(k_x2, (B, C2, L), jnp.float32)
    p2 = _make_params(k_p2, C2, C2, C2 // 16, with_downsample=False)
    out2 = jax.block_until_ready(residual_block_forward(x2, p2))
    ref2 = jax.block_until_ready(_reference(x2, p2))
    np.testing.assert_allclose(np.asarray(out2), np.asarray(ref2), rtol=1e-4, atol=1e-4)

    print("KERNEL_OK")
</pallas_src>

<mosaic_0001>
module attributes {stable_mosaic.version = 11 : i64} {
  func.func @residual_block_kernel(%arg0: i32, %arg1: memref<1x8x256xf32, #tpu.memory_space<vmem>>, %arg2: memref<32x24xf32, #tpu.memory_space<vmem>>, %arg3: memref<32x96xf32, #tpu.memory_space<vmem>>, %arg4: memref<32x3xf32, #tpu.memory_space<vmem>>, %arg5: memref<2x32xf32, #tpu.memory_space<vmem>>, %arg6: memref<32x2xf32, #tpu.memory_space<vmem>>, %arg7: memref<32x8xf32, #tpu.memory_space<vmem>>, %arg8: memref<2x8xf32, #tpu.memory_space<smem>>, %arg9: memref<1x32x256xf32, #tpu.memory_space<vmem>>) attributes {dimension_semantics = [#tpu.dimension_semantics<parallel>], iteration_bounds = array<i64: 1>, scalar_prefetch = 0 : i64, scratch_operands = 0 : i64, tpu.core_type = #tpu.core_type<tc>, window_params = [{transform_indices = @transform_0, window_bounds = array<i64: 1, 8, 256>}, {pipeline_mode = #tpu.pipeline_mode<synchronous>, transform_indices = @transform_1, window_bounds = array<i64: 32, 24>}, {pipeline_mode = #tpu.pipeline_mode<synchronous>, transform_indices = @transform_2, window_bounds = array<i64: 32, 96>}, {pipeline_mode = #tpu.pipeline_mode<synchronous>, transform_indices = @transform_3, window_bounds = array<i64: 32, 3>}, {pipeline_mode = #tpu.pipeline_mode<synchronous>, transform_indices = @transform_4, window_bounds = array<i64: 2, 32>}, {pipeline_mode = #tpu.pipeline_mode<synchronous>, transform_indices = @transform_5, window_bounds = array<i64: 32, 2>}, {pipeline_mode = #tpu.pipeline_mode<synchronous>, transform_indices = @transform_6, window_bounds = array<i64: 32, 8>}, {transform_indices = @transform_7, window_bounds = array<i64: 2, 8>}, {transform_indices = @transform_8, window_bounds = array<i64: 1, 32, 256>}]} {
    %0 = tpu.iota {dimensions = array<i32: 1>} : vector<1x256xi32>
    %c128_i32 = arith.constant 128 : i32
    %c0_i32 = arith.constant 0 : i32
    %1 = arith.cmpi eq, %c128_i32, %c0_i32 : i32
    %c1_i32 = arith.constant 1 : i32
    %2 = arith.select %1, %c1_i32, %c128_i32 : i32
    %3 = vector.broadcast %2 : i32 to vector<1x256xi32>
    %4 = arith.remsi %0, %3 : vector<1x256xi32>
    %c0_i32_0 = arith.constant 0 : i32
    %5 = vector.broadcast %c0_i32_0 : i32 to vector<1x256xi32>
    %6 = arith.cmpi ne, %4, %5 : vector<1x256xi32>
    %c0_i32_1 = arith.constant 0 : i32
    %7 = vector.broadcast %c0_i32_1 : i32 to vector<1x256xi32>
    %8 = arith.cmpi slt, %4, %7 : vector<1x256xi32>
    %c0_i32_2 = arith.constant 0 : i32
    %9 = arith.cmpi slt, %2, %c0_i32_2 : i32
    %10 = vector.broadcast %9 : i1 to vector<1x256xi1>
    %11 = vector.broadcast %10 : vector<1x256xi1> to vector<1x256xi1>
    %12 = arith.xori %8, %11 : vector<1x256xi1>
    %13 = arith.andi %12, %6 : vector<1x256xi1>
    %14 = vector.broadcast %2 : i32 to vector<1x256xi32>
    %15 = arith.addi %4, %14 : vector<1x256xi32>
    %16 = arith.select %13, %15, %4 : vector<1x256xi1>, vector<1x256xi32>
    %c-3_i32 = arith.constant -3 : i32
    %17 = vector.broadcast %c-3_i32 : i32 to vector<1x256xi32>
    %18 = arith.addi %16, %17 : vector<1x256xi32>
    %c0_i32_3 = arith.constant 0 : i32
    %19 = vector.broadcast %c0_i32_3 : i32 to vector<1x256xi32>
    %20 = arith.cmpi sge, %18, %19 : vector<1x256xi32>
    %c-3_i32_4 = arith.constant -3 : i32
    %21 = vector.broadcast %c-3_i32_4 : i32 to vector<1x256xi32>
    %22 = arith.addi %16, %21 : vector<1x256xi32>
    %c128_i32_5 = arith.constant 128 : i32
    %23 = vector.broadcast %c128_i32_5 : i32 to vector<1x256xi32>
    %24 = arith.cmpi slt, %22, %23 : vector<1x256xi32>
    %25 = arith.andi %20, %24 : vector<1x256xi1>
    %c-2_i32 = arith.constant -2 : i32
    %26 = vector.broadcast %c-2_i32 : i32 to vector<1x256xi32>
    %27 = arith.addi %16, %26 : vector<1x256xi32>
    %c0_i32_6 = arith.constant 0 : i32
    %28 = vector.broadcast %c0_i32_6 : i32 to vector<1x256xi32>
    %29 = arith.cmpi sge, %27, %28 : vector<1x256xi32>
    %c-2_i32_7 = arith.constant -2 : i32
    %30 = vector.broadcast %c-2_i32_7 : i32 to vector<1x256xi32>
    %31 = arith.addi %16, %30 : vector<1x256xi32>
    %c128_i32_8 = arith.constant 128 : i32
    %32 = vector.broadcast %c128_i32_8 : i32 to vector<1x256xi32>
    %33 = arith.cmpi slt, %31, %32 : vector<1x256xi32>
    %34 = arith.andi %29, %33 : vector<1x256xi1>
    %c-1_i32 = arith.constant -1 : i32
    %35 = vector.broadcast %c-1_i32 : i32 to vector<1x256xi32>
    %36 = arith.addi %16, %35 : vector<1x256xi32>
    %c0_i32_9 = arith.constant 0 : i32
    %37 = vector.broadcast %c0_i32_9 : i32 to vector<1x256xi32>
    %38 = arith.cmpi sge, %36, %37 : vector<1x256xi32>
    %c-1_i32_10 = arith.constant -1 : i32
    %39 = vector.broadcast %c-1_i32_10 : i32 to vector<1x256xi32>
    %40 = arith.addi %16, %39 : vector<1x256xi32>
    %c128_i32_11 = arith.constant 128 : i32
    %41 = vector.broadcast %c128_i32_11 : i32 to vector<1x256xi32>
    %42 = arith.cmpi slt, %40, %41 : vector<1x256xi32>
    %43 = arith.andi %38, %42 : vector<1x256xi1>
    %c1_i32_12 = arith.constant 1 : i32
    %44 = vector.broadcast %c1_i32_12 : i32 to vector<1x256xi32>
    %45 = arith.addi %16, %44 : vector<1x256xi32>
    %c0_i32_13 = arith.constant 0 : i32
    %46 = vector.broadcast %c0_i32_13 : i32 to vector<1x256xi32>
    %47 = arith.cmpi sge, %45, %46 : vector<1x256xi32>
    %c1_i32_14 = arith.constant 1 : i32
    %48 = vector.broadcast %c1_i32_14 : i32 to vector<1x256xi32>
    %49 = arith.addi %16, %48 : vector<1x256xi32>
    %c128_i32_15 = arith.constant 128 : i32
    %50 = vector.broadcast %c128_i32_15 : i32 to vector<1x256xi32>
    %51 = arith.cmpi slt, %49, %50 : vector<1x256xi32>
    %52 = arith.andi %47, %51 : vector<1x256xi1>
    %c2_i32 = arith.constant 2 : i32
    %53 = vector.broadcast %c2_i32 : i32 to vector<1x256xi32>
    %54 = arith.addi %16, %53 : vector<1x256xi32>
    %c0_i32_16 = arith.constant 0 : i32
    %55 = vector.broadcast %c0_i32_16 : i32 to vector<1x256xi32>
    %56 = arith.cmpi sge, %54, %55 : vector<1x256xi32>
    %c2_i32_17 = arith.constant 2 : i32
    %57 = vector.broadcast %c2_i32_17 : i32 to vector<1x256xi32>
    %58 = arith.addi %16, %57 : vector<1x256xi32>
    %c128_i32_18 = arith.constant 128 : i32
    %59 = vector.broadcast %c128_i32_18 : i32 to vector<1x256xi32>
    %60 = arith.cmpi slt, %58, %59 : vector<1x256xi32>
    %61 = arith.andi %56, %60 : vector<1x256xi1>
    %c3_i32 = arith.constant 3 : i32
    %62 = vector.broadcast %c3_i32 : i32 to vector<1x256xi32>
    %63 = arith.addi %16, %62 : vector<1x256xi32>
    %c0_i32_19 = arith.constant 0 : i32
    %64 = vector.broadcast %c0_i32_19 : i32 to vector<1x256xi32>
    %65 = arith.cmpi sge, %63, %64 : vector<1x256xi32>
    %c3_i32_20 = arith.constant 3 : i32
    %66 = vector.broadcast %c3_i32_20 : i32 to vector<1x256xi32>
    %67 = arith.addi %16, %66 : vector<1x256xi32>
    %c128_i32_21 = arith.constant 128 : i32
    %68 = vector.broadcast %c128_i32_21 : i32 to vector<1x256xi32>
    %69 = arith.cmpi slt, %67, %68 : vector<1x256xi32>
    %70 = arith.andi %65, %69 : vector<1x256xi1>
    %c0 = arith.constant 0 : index
    %c0_22 = arith.constant 0 : index
    %c0_23 = arith.constant 0 : index
    %71 = vector.load %arg1[%c0, %c0_22, %c0_23] : memref<1x8x256xf32, #tpu.memory_space<vmem>>, vector<1x8x256xf32>
    %72 = vector.shape_cast %71 : vector<1x8x256xf32> to vector<8x256xf32>
    %c0_24 = arith.constant 0 : index
    %c0_25 = arith.constant 0 : index
    %73 = vector.load %arg4[%c0_24, %c0_25] : memref<32x3xf32, #tpu.memory_space<vmem>>, vector<32x1xf32>
    %c0_26 = arith.constant 0 : index
    %c1 = arith.constant 1 : index
    %74 = vector.load %arg4[%c0_26, %c1] : memref<32x3xf32, #tpu.memory_space<vmem>>, vector<32x1xf32>
    %c1_i32_27 = arith.constant 1 : i32
    %75 = tpu.dynamic_rotate %72 by %c1_i32_27 dim 1 : vector<8x256xf32>, i32 -> vector<8x256xf32>
    %cst = arith.constant 0.000000e+00 : f32
    %76 = vector.shape_cast %43 : vector<1x256xi1> to vector<1x256xi1>
    %77 = vector.broadcast %76 : vector<1x256xi1> to vector<8x256xi1>
    %78 = vector.broadcast %cst : f32 to vector<8x256xf32>
    %79 = arith.select %77, %75, %78 : vector<8x256xi1>, vector<8x256xf32>
    %c255_i32 = arith.constant 255 : i32
    %80 = tpu.dynamic_rotate %72 by %c255_i32 dim 1 : vector<8x256xf32>, i32 -> vector<8x256xf32>
    %cst_28 = arith.constant 0.000000e+00 : f32
    %81 = vector.shape_cast %52 : vector<1x256xi1> to vector<1x256xi1>
    %82 = vector.broadcast %81 : vector<1x256xi1> to vector<8x256xi1>
    %83 = vector.broadcast %cst_28 : f32 to vector<8x256xf32>
    %84 = arith.select %82, %80, %83 : vector<8x256xi1>, vector<8x256xf32>
    %85 = tpu.concatenate %79, %72, %84 in 0 : vector<8x256xf32>, vector<8x256xf32>, vector<8x256xf32> -> vector<24x256xf32>
    %c0_29 = arith.constant 0 : index
    %c0_30 = arith.constant 0 : index
    %86 = vector.load %arg2[%c0_29, %c0_30] : memref<32x24xf32, #tpu.memory_space<vmem>>, vector<32x24xf32>
    %cst_31 = arith.constant dense<0.000000e+00> : vector<32x256xf32>
    %87 = tpu.matmul %86, %85, %cst_31 {dimension_numbers = #tpu.dot_dimension_numbers<[1], [0], [0], [1], [0, 0, 1, 1], [], []>} : vector<32x24xf32>, vector<24x256xf32>, vector<32x256xf32> -> vector<32x256xf32>
    %88 = vector.broadcast %73 : vector<32x1xf32> to vector<32x256xf32>
    %89 = arith.addf %87, %88 : vector<32x256xf32>
    %cst_32 = arith.constant 0.000000e+00 : f32
    %90 = vector.broadcast %cst_32 : f32 to vector<32x256xf32>
    %91 = arith.maximumf %89, %90 : vector<32x256xf32>
    %c1_i32_33 = arith.constant 1 : i32
    %92 = tpu.dynamic_rotate %91 by %c1_i32_33 dim 1 : vector<32x256xf32>, i32 -> vector<32x256xf32>
    %cst_34 = arith.constant 0.000000e+00 : f32
    %93 = vector.shape_cast %43 : vector<1x256xi1> to vector<1x256xi1>
    %94 = vector.broadcast %93 : vector<1x256xi1> to vector<32x256xi1>
    %95 = vector.broadcast %cst_34 : f32 to vector<32x256xf32>
    %96 = arith.select %94, %92, %95 : vector<32x256xi1>, vector<32x256xf32>
    %c255_i32_35 = arith.constant 255 : i32
    %97 = tpu.dynamic_rotate %91 by %c255_i32_35 dim 1 : vector<32x256xf32>, i32 -> vector<32x256xf32>
    %cst_36 = arith.constant 0.000000e+00 : f32
    %98 = vector.shape_cast %52 : vector<1x256xi1> to vector<1x256xi1>
    %99 = vector.broadcast %98 : vector<1x256xi1> to vector<32x256xi1>
    %100 = vector.broadcast %cst_36 : f32 to vector<32x256xf32>
    %101 = arith.select %99, %97, %100 : vector<32x256xi1>, vector<32x256xf32>
    %102 = tpu.concatenate %96, %91, %101 in 0 : vector<32x256xf32>, vector<32x256xf32>, vector<32x256xf32> -> vector<96x256xf32>
    %c0_37 = arith.constant 0 : index
    %c0_38 = arith.constant 0 : index
    %103 = vector.load %arg3[%c0_37, %c0_38] : memref<32x96xf32, #tpu.memory_space<vmem>>, vector<32x96xf32>
    %cst_39 = arith.constant dense<0.000000e+00> : vector<32x256xf32>
    %104 = tpu.matmul %103, %102, %cst_39 {dimension_numbers = #tpu.dot_dimension_numbers<[1], [0], [0], [1], [0, 0, 1, 1], [], []>} : vector<32x96xf32>, vector<96x256xf32>, vector<32x256xf32> -> vector<32x256xf32>
    %105 = vector.broadcast %74 : vector<32x1xf32> to vector<32x256xf32>
    %106 = arith.addf %104, %105 : vector<32x256xf32>
    %107 = vector.extract_strided_slice %106 {offsets = [0, 0], sizes = [32, 128], strides = [1, 1]} : vector<32x256xf32> to vector<32x128xf32>
    %cst_40 = arith.constant dense<0.000000e+00> : vector<32xf32>
    %108 = vector.multi_reduction <add>, %107, %cst_40 [1] : vector<32x128xf32> to vector<32xf32>
    %109 = vector.shape_cast %108 : vector<32xf32> to vector<32x1xf32>
    %cst_41 = arith.constant 1.280000e+02 : f32
    %110 = vector.broadcast %cst_41 : f32 to vector<32x1xf32>
    %111 = arith.divf %109, %110 : vector<32x1xf32>
    %cst_42 = arith.constant dense<0xFF800000> : vector<32xf32>
    %112 = vector.multi_reduction <maximumf>, %107, %cst_42 [1] : vector<32x128xf32> to vector<32xf32>
    %113 = vector.shape_cast %112 : vector<32xf32> to vector<32x1xf32>
    %114 = vector.extract_strided_slice %106 {offsets = [0, 128], sizes = [32, 128], strides = [1, 1]} : vector<32x256xf32> to vector<32x128xf32>
    %cst_43 = arith.constant dense<0.000000e+00> : vector<32xf32>
    %115 = vector.multi_reduction <add>, %114, %cst_43 [1] : vector<32x128xf32> to vector<32xf32>
    %116 = vector.shape_cast %115 : vector<32xf32> to vector<32x1xf32>
    %cst_44 = arith.constant 1.280000e+02 : f32
    %117 = vector.broadcast %cst_44 : f32 to vector<32x1xf32>
    %118 = arith.divf %116, %117 : vector<32x1xf32>
    %cst_45 = arith.constant dense<0xFF800000> : vector<32xf32>
    %119 = vector.multi_reduction <maximumf>, %114, %cst_45 [1] : vector<32x128xf32> to vector<32xf32>
    %120 = vector.shape_cast %119 : vector<32xf32> to vector<32x1xf32>
    %121 = tpu.concatenate %111, %113, %118, %120 in 1 : vector<32x1xf32>, vector<32x1xf32>, vector<32x1xf32>, vector<32x1xf32> -> vector<32x4xf32>
    %c0_46 = arith.constant 0 : index
    %c0_47 = arith.constant 0 : index
    %122 = vector.load %arg5[%c0_46, %c0_47] : memref<2x32xf32, #tpu.memory_space<vmem>>, vector<2x32xf32>
    %cst_48 = arith.constant dense<0.000000e+00> : vector<2x4xf32>
    %123 = tpu.matmul %122, %121, %cst_48 {dimension_numbers = #tpu.dot_dimension_numbers<[1], [0], [0], [1], [0, 0, 1, 1], [], []>} : vector<2x32xf32>, vector<32x4xf32>, vector<2x4xf32> -> vector<2x4xf32>
    %cst_49 = arith.constant 0.000000e+00 : f32
    %124 = vector.broadcast %cst_49 : f32 to vector<2x4xf32>
    %125 = arith.maximumf %123, %124 : vector<2x4xf32>
    %c0_50 = arith.constant 0 : index
    %c0_51 = arith.constant 0 : index
    %126 = vector.load %arg6[%c0_50, %c0_51] : memref<32x2xf32, #tpu.memory_space<vmem>>, vector<32x2xf32>
    %cst_52 = arith.constant dense<0.000000e+00> : vector<32x4xf32>
    %127 = tpu.matmul %126, %125, %cst_52 {dimension_numbers = #tpu.dot_dimension_numbers<[1], [0], [0], [1], [0, 0, 1, 1], [], []>} : vector<32x2xf32>, vector<2x4xf32>, vector<32x4xf32> -> vector<32x4xf32>
    %128 = vector.extract_strided_slice %127 {offsets = [0, 0], sizes = [32, 1], strides = [1, 1]} : vector<32x4xf32> to vector<32x1xf32>
    %129 = vector.extract_strided_slice %127 {offsets = [0, 1], sizes = [32, 1], strides = [1, 1]} : vector<32x4xf32> to vector<32x1xf32>
    %130 = arith.addf %128, %129 : vector<32x1xf32>
    %cst_53 = arith.constant 0.000000e+00 : f32
    %131 = vector.broadcast %cst_53 : f32 to vector<32x1xf32>
    %132 = arith.subf %131, %130 : vector<32x1xf32>
    %133 = math.exp %132 : vector<32x1xf32>
    %cst_54 = arith.constant 1.000000e+00 : f32
    %134 = vector.broadcast %cst_54 : f32 to vector<32x1xf32>
    %135 = arith.addf %134, %133 : vector<32x1xf32>
    %136 = tpu.reciprocal %135 {approx = true} : vector<32x1xf32> -> vector<32x1xf32>
    %137 = arith.mulf %135, %136 : vector<32x1xf32>
    %cst_55 = arith.constant 2.000000e+00 : f32
    %138 = vector.broadcast %cst_55 : f32 to vector<32x1xf32>
    %139 = arith.subf %138, %137 : vector<32x1xf32>
    %140 = arith.mulf %136, %139 : vector<32x1xf32>
    %141 = vector.shape_cast %140 : vector<32x1xf32> to vector<32x1xf32>
    %142 = vector.broadcast %141 : vector<32x1xf32> to vector<32x128xf32>
    %143 = vector.extract_strided_slice %127 {offsets = [0, 2], sizes = [32, 1], strides = [1, 1]} : vector<32x4xf32> to vector<32x1xf32>
    %144 = vector.extract_strided_slice %127 {offsets = [0, 3], sizes = [32, 1], strides = [1, 1]} : vector<32x4xf32> to vector<32x1xf32>
    %145 = arith.addf %143, %144 : vector<32x1xf32>
    %cst_56 = arith.constant 0.000000e+00 : f32
    %146 = vector.broadcast %cst_56 : f32 to vector<32x1xf32>
    %147 = arith.subf %146, %145 : vector<32x1xf32>
    %148 = math.exp %147 : vector<32x1xf32>
    %cst_57 = arith.constant 1.000000e+00 : f32
    %149 = vector.broadcast %cst_57 : f32 to vector<32x1xf32>
    %150 = arith.addf %149, %148 : vector<32x1xf32>
    %151 = tpu.reciprocal %150 {approx = true} : vector<32x1xf32> -> vector<32x1xf32>
    %152 = arith.mulf %150, %151 : vector<32x1xf32>
    %cst_58 = arith.constant 2.000000e+00 : f32
    %153 = vector.broadcast %cst_58 : f32 to vector<32x1xf32>
    %154 = arith.subf %153, %152 : vector<32x1xf32>
    %155 = arith.mulf %151, %154 : vector<32x1xf32>
    %156 = vector.shape_cast %155 : vector<32x1xf32> to vector<32x1xf32>
    %157 = vector.broadcast %156 : vector<32x1xf32> to vector<32x128xf32>
    %158 = tpu.concatenate %142, %157 in 1 : vector<32x128xf32>, vector<32x128xf32> -> vector<32x256xf32>
    %159 = arith.mulf %106, %158 : vector<32x256xf32>
    %cst_59 = arith.constant dense<0.000000e+00> : vector<256xf32>
    %160 = vector.multi_reduction <add>, %159, %cst_59 [0] : vector<32x256xf32> to vector<256xf32>
    %161 = vector.shape_cast %160 : vector<256xf32> to vector<1x256xf32>
    %cst_60 = arith.constant dense<0xFF800000> : vector<256xf32>
    %162 = vector.multi_reduction <maximumf>, %159, %cst_60 [0] : vector<32x256xf32> to vector<256xf32>
    %163 = vector.shape_cast %162 : vector<256xf32> to vector<1x256xf32>
    %164 = tpu.concatenate %161, %163 in 0 : vector<1x256xf32>, vector<1x256xf32> -> vector<2x256xf32>
    %c0_61 = arith.constant 0 : index
    %c7 = arith.constant 7 : index
    %165 = memref.load %arg8[%c0_61, %c7] : memref<2x8xf32, #tpu.memory_space<smem>>
    %166 = vector.broadcast %165 : f32 to vector<1x256xf32>
    %c3_i32_62 = arith.constant 3 : i32
    %167 = tpu.dynamic_rotate %164 by %c3_i32_62 dim 1 : vector<2x256xf32>, i32 -> vector<2x256xf32>
    %cst_63 = arith.constant 0.000000e+00 : f32
    %168 = vector.shape_cast %25 : vector<1x256xi1> to vector<1x256xi1>
    %169 = vector.broadcast %168 : vector<1x256xi1> to vector<2x256xi1>
    %170 = vector.broadcast %cst_63 : f32 to vector<2x256xf32>
    %171 = arith.select %169, %167, %170 : vector<2x256xi1>, vector<2x256xf32>
    %c0_64 = arith.constant 0 : index
    %c0_65 = arith.constant 0 : index
    %172 = memref.load %arg8[%c0_64, %c0_65] : memref<2x8xf32, #tpu.memory_space<smem>>
    %173 = vector.extract_strided_slice %171 {offsets = [0, 0], sizes = [1, 256], strides = [1, 1]} : vector<2x256xf32> to vector<1x256xf32>
    %174 = vector.broadcast %172 : f32 to vector<1x256xf32>
    %175 = arith.mulf %174, %173 : vector<1x256xf32>
    %176 = arith.addf %166, %175 : vector<1x256xf32>
    %c1_66 = arith.constant 1 : index
    %c0_67 = arith.constant 0 : index
    %177 = memref.load %arg8[%c1_66, %c0_67] : memref<2x8xf32, #tpu.memory_space<smem>>
    %178 = vector.extract_strided_slice %171 {offsets = [1, 0], sizes = [1, 256], strides = [1, 1]} : vector<2x256xf32> to vector<1x256xf32>
    %179 = vector.broadcast %177 : f32 to vector<1x256xf32>
    %180 = arith.mulf %179, %178 : vector<1x256xf32>
    %181 = arith.addf %176, %180 : vector<1x256xf32>
    %c2_i32_68 = arith.constant 2 : i32
    %182 = tpu.dynamic_rotate %164 by %c2_i32_68 dim 1 : vector<2x256xf32>, i32 -> vector<2x256xf32>
    %cst_69 = arith.constant 0.000000e+00 : f32
    %183 = vector.shape_cast %34 : vector<1x256xi1> to vector<1x256xi1>
    %184 = vector.broadcast %183 : vector<1x256xi1> to vector<2x256xi1>
    %185 = vector.broadcast %cst_69 : f32 to vector<2x256xf32>
    %186 = arith.select %184, %182, %185 : vector<2x256xi1>, vector<2x256xf32>
    %c0_70 = arith.constant 0 : index
    %c1_71 = arith.constant 1 : index
    %187 = memref.load %arg8[%c0_70, %c1_71] : memref<2x8xf32, #tpu.memory_space<smem>>
    %188 = vector.extract_strided_slice %186 {offsets = [0, 0], sizes = [1, 256], strides = [1, 1]} : vector<2x256xf32> to vector<1x256xf32>
    %189 = vector.broadcast %187 : f32 to vector<1x256xf32>
    %190 = arith.mulf %189, %188 : vector<1x256xf32>
    %191 = arith.addf %181, %190 : vector<1x256xf32>
    %c1_72 = arith.constant 1 : index
    %c1_73 = arith.constant 1 : index
    %192 = memref.load %arg8[%c1_72, %c1_73] : memref<2x8xf32, #tpu.memory_space<smem>>
    %193 = vector.extract_strided_slice %186 {offsets = [1, 0], sizes = [1, 256], strides = [1, 1]} : vector<2x256xf32> to vector<1x256xf32>
    %194 = vector.broadcast %192 : f32 to vector<1x256xf32>
    %195 = arith.mulf %194, %193 : vector<1x256xf32>
    %196 = arith.addf %191, %195 : vector<1x256xf32>
    %c1_i32_74 = arith.constant 1 : i32
    %197 = tpu.dynamic_rotate %164 by %c1_i32_74 dim 1 : vector<2x256xf32>, i32 -> vector<2x256xf32>
    %cst_75 = arith.constant 0.000000e+00 : f32
    %198 = vector.shape_cast %43 : vector<1x256xi1> to vector<1x256xi1>
    %199 = vector.broadcast %198 : vector<1x256xi1> to vector<2x256xi1>
    %200 = vector.broadcast %cst_75 : f32 to vector<2x256xf32>
    %201 = arith.select %199, %197, %200 : vector<2x256xi1>, vector<2x256xf32>
    %c0_76 = arith.constant 0 : index
    %c2 = arith.constant 2 : index
    %202 = memref.load %arg8[%c0_76, %c2] : memref<2x8xf32, #tpu.memory_space<smem>>
    %203 = vector.extract_strided_slice %201 {offsets = [0, 0], sizes = [1, 256], strides = [1, 1]} : vector<2x256xf32> to vector<1x256xf32>
    %204 = vector.broadcast %202 : f32 to vector<1x256xf32>
    %205 = arith.mulf %204, %203 : vector<1x256xf32>
    %206 = arith.addf %196, %205 : vector<1x256xf32>
    %c1_77 = arith.constant 1 : index
    %c2_78 = arith.constant 2 : index
    %207 = memref.load %arg8[%c1_77, %c2_78] : memref<2x8xf32, #tpu.memory_space<smem>>
    %208 = vector.extract_strided_slice %201 {offsets = [1, 0], sizes = [1, 256], strides = [1, 1]} : vector<2x256xf32> to vector<1x256xf32>
    %209 = vector.broadcast %207 : f32 to vector<1x256xf32>
    %210 = arith.mulf %209, %208 : vector<1x256xf32>
    %211 = arith.addf %206, %210 : vector<1x256xf32>
    %c0_79 = arith.constant 0 : index
    %c3 = arith.constant 3 : index
    %212 = memref.load %arg8[%c0_79, %c3] : memref<2x8xf32, #tpu.memory_space<smem>>
    %213 = vector.extract_strided_slice %164 {offsets = [0, 0], sizes = [1, 256], strides = [1, 1]} : vector<2x256xf32> to vector<1x256xf32>
    %214 = vector.broadcast %212 : f32 to vector<1x256xf32>
    %215 = arith.mulf %214, %213 : vector<1x256xf32>
    %216 = arith.addf %211, %215 : vector<1x256xf32>
    %c1_80 = arith.constant 1 : index
    %c3_81 = arith.constant 3 : index
    %217 = memref.load %arg8[%c1_80, %c3_81] : memref<2x8xf32, #tpu.memory_space<smem>>
    %218 = vector.extract_strided_slice %164 {offsets = [1, 0], sizes = [1, 256], strides = [1, 1]} : vector<2x256xf32> to vector<1x256xf32>
    %219 = vector.broadcast %217 : f32 to vector<1x256xf32>
    %220 = arith.mulf %219, %218 : vector<1x256xf32>
    %221 = arith.addf %216, %220 : vector<1x256xf32>
    %c255_i32_82 = arith.constant 255 : i32
    %222 = tpu.dynamic_rotate %164 by %c255_i32_82 dim 1 : vector<2x256xf32>, i32 -> vector<2x256xf32>
    %cst_83 = arith.constant 0.000000e+00 : f32
    %223 = vector.shape_cast %52 : vector<1x256xi1> to vector<1x256xi1>
    %224 = vector.broadcast %223 : vector<1x256xi1> to vector<2x256xi1>
    %225 = vector.broadcast %cst_83 : f32 to vector<2x256xf32>
    %226 = arith.select %224, %222, %225 : vector<2x256xi1>, vector<2x256xf32>
    %c0_84 = arith.constant 0 : index
    %c4 = arith.constant 4 : index
    %227 = memref.load %arg8[%c0_84, %c4] : memref<2x8xf32, #tpu.memory_space<smem>>
    %228 = vector.extract_strided_slice %226 {offsets = [0, 0], sizes = [1, 256], strides = [1, 1]} : vector<2x256xf32> to vector<1x256xf32>
    %229 = vector.broadcast %227 : f32 to vector<1x256xf32>
    %230 = arith.mulf %229, %228 : vector<1x256xf32>
    %231 = arith.addf %221, %230 : vector<1x256xf32>
    %c1_85 = arith.constant 1 : index
    %c4_86 = arith.constant 4 : index
    %232 = memref.load %arg8[%c1_85, %c4_86] : memref<2x8xf32, #tpu.memory_space<smem>>
    %233 = vector.extract_strided_slice %226 {offsets = [1, 0], sizes = [1, 256], strides = [1, 1]} : vector<2x256xf32> to vector<1x256xf32>
    %234 = vector.broadcast %232 : f32 to vector<1x256xf32>
    %235 = arith.mulf %234, %233 : vector<1x256xf32>
    %236 = arith.addf %231, %235 : vector<1x256xf32>
    %c254_i32 = arith.constant 254 : i32
    %237 = tpu.dynamic_rotate %164 by %c254_i32 dim 1 : vector<2x256xf32>, i32 -> vector<2x256xf32>
    %cst_87 = arith.constant 0.000000e+00 : f32
    %238 = vector.shape_cast %61 : vector<1x256xi1> to vector<1x256xi1>
    %239 = vector.broadcast %238 : vector<1x256xi1> to vector<2x256xi1>
    %240 = vector.broadcast %cst_87 : f32 to vector<2x256xf32>
    %241 = arith.select %239, %237, %240 : vector<2x256xi1>, vector<2x256xf32>
    %c0_88 = arith.constant 0 : index
    %c5 = arith.constant 5 : index
    %242 = memref.load %arg8[%c0_88, %c5] : memref<2x8xf32, #tpu.memory_space<smem>>
    %243 = vector.extract_strided_slice %241 {offsets = [0, 0], sizes = [1, 256], strides = [1, 1]} : vector<2x256xf32> to vector<1x256xf32>
    %244 = vector.broadcast %242 : f32 to vector<1x256xf32>
    %245 = arith.mulf %244, %243 : vector<1x256xf32>
    %246 = arith.addf %236, %245 : vector<1x256xf32>
    %c1_89 = arith.constant 1 : index
    %c5_90 = arith.constant 5 : index
    %247 = memref.load %arg8[%c1_89, %c5_90] : memref<2x8xf32, #tpu.memory_space<smem>>
    %248 = vector.extract_strided_slice %241 {offsets = [1, 0], sizes = [1, 256], strides = [1, 1]} : vector<2x256xf32> to vector<1x256xf32>
    %249 = vector.broadcast %247 : f32 to vector<1x256xf32>
    %250 = arith.mulf %249, %248 : vector<1x256xf32>
    %251 = arith.addf %246, %250 : vector<1x256xf32>
    %c253_i32 = arith.constant 253 : i32
    %252 = tpu.dynamic_rotate %164 by %c253_i32 dim 1 : vector<2x256xf32>, i32 -> vector<2x256xf32>
    %cst_91 = arith.constant 0.000000e+00 : f32
    %253 = vector.shape_cast %70 : vector<1x256xi1> to vector<1x256xi1>
    %254 = vector.broadcast %253 : vector<1x256xi1> to vector<2x256xi1>
    %255 = vector.broadcast %cst_91 : f32 to vector<2x256xf32>
    %256 = arith.select %254, %252, %255 : vector<2x256xi1>, vector<2x256xf32>
    %c0_92 = arith.constant 0 : index
    %c6 = arith.constant 6 : index
    %257 = memref.load %arg8[%c0_92, %c6] : memref<2x8xf32, #tpu.memory_space<smem>>
    %258 = vector.extract_strided_slice %256 {offsets = [0, 0], sizes = [1, 256], strides = [1, 1]} : vector<2x256xf32> to vector<1x256xf32>
    %259 = vector.broadcast %257 : f32 to vector<1x256xf32>
    %260 = arith.mulf %259, %258 : vector<1x256xf32>
    %261 = arith.addf %251, %260 : vector<1x256xf32>
    %c1_93 = arith.constant 1 : index
    %c6_94 = arith.constant 6 : index
    %262 = memref.load %arg8[%c1_93, %c6_94] : memref<2x8xf32, #tpu.memory_space<smem>>
    %263 = vector.extract_strided_slice %256 {offsets = [1, 0], sizes = [1, 256], strides = [1, 1]} : vector<2x256xf32> to vector<1x256xf32>
    %264 = vector.broadcast %262 : f32 to vector<1x256xf32>
    %265 = arith.mulf %264, %263 : vector<1x256xf32>
    %266 = arith.addf %261, %265 : vector<1x256xf32>
    %cst_95 = arith.constant 0.000000e+00 : f32
    %267 = vector.broadcast %cst_95 : f32 to vector<1x256xf32>
    %268 = arith.subf %267, %266 : vector<1x256xf32>
    %269 = math.exp %268 : vector<1x256xf32>
    %cst_96 = arith.constant 1.000000e+00 : f32
    %270 = vector.broadcast %cst_96 : f32 to vector<1x256xf32>
    %271 = arith.addf %270, %269 : vector<1x256xf32>
    %272 = tpu.reciprocal %271 {approx = true} : vector<1x256xf32> -> vector<1x256xf32>
    %273 = arith.mulf %271, %272 : vector<1x256xf32>
    %cst_97 = arith.constant 2.000000e+00 : f32
    %274 = vector.broadcast %cst_97 : f32 to vector<1x256xf32>
    %275 = arith.subf %274, %273 : vector<1x256xf32>
    %276 = arith.mulf %272, %275 : vector<1x256xf32>
    %277 = vector.broadcast %276 : vector<1x256xf32> to vector<32x256xf32>
    %278 = arith.mulf %159, %277 : vector<32x256xf32>
    %c0_98 = arith.constant 0 : index
    %c0_99 = arith.constant 0 : index
    %279 = vector.load %arg7[%c0_98, %c0_99] : memref<32x8xf32, #tpu.memory_space<vmem>>, vector<32x8xf32>
    %cst_100 = arith.constant dense<0.000000e+00> : vector<32x256xf32>
    %280 = tpu.matmul %279, %72, %cst_100 {dimension_numbers = #tpu.dot_dimension_numbers<[1], [0], [0], [1], [0, 0, 1, 1], [], []>} : vector<32x8xf32>, vector<8x256xf32>, vector<32x256xf32> -> vector<32x256xf32>
    %c0_101 = arith.constant 0 : index
    %c2_102 = arith.constant 2 : index
    %281 = vector.load %arg4[%c0_101, %c2_102] : memref<32x3xf32, #tpu.memory_space<vmem>>, vector<32x1xf32>
    %282 = vector.broadcast %281 : vector<32x1xf32> to vector<32x256xf32>
    %283 = arith.addf %280, %282 : vector<32x256xf32>
    %284 = arith.addf %278, %283 : vector<32x256xf32>
    %cst_103 = arith.constant 0.000000e+00 : f32
    %285 = vector.broadcast %cst_103 : f32 to vector<32x256xf32>
    %286 = arith.maximumf %284, %285 : vector<32x256xf32>
    %c0_104 = arith.constant 0 : index
    %c0_105 = arith.constant 0 : index
    %c0_106 = arith.constant 0 : index
    %287 = vector.load %arg9[%c0_104, %c0_105, %c0_106] : memref<1x32x256xf32, #tpu.memory_space<vmem>>, vector<1x32x256xf32>
    %288 = vector.shape_cast %287 : vector<1x32x256xf32> to vector<32x256xf32>
    %289 = vector.shape_cast %286 : vector<32x256xf32> to vector<1x32x256xf32>
    tpu.vector_store %arg9[%c0_104, %c0_105, %c0_106], %289 {strides = array<i32>} : memref<1x32x256xf32, #tpu.memory_space<vmem>>, vector<1x32x256xf32>,
    return
  }
  func.func @transform_0(%arg0: i32) -> (i32, i32, i32) {
    %c0_i32 = arith.constant 0 : i32
    %c0_i32_0 = arith.constant 0 : i32
    %c0_i32_1 = arith.constant 0 : i32
    return %arg0, %c0_i32, %c0_i32_0 : i32, i32, i32
  }
  func.func @transform_1(%arg0: i32) -> (i32, i32) {
    %c0_i32 = arith.constant 0 : i32
    %c0_i32_0 = arith.constant 0 : i32
    %c0_i32_1 = arith.constant 0 : i32
    return %c0_i32, %c0_i32_0 : i32, i32
  }
  func.func @transform_2(%arg0: i32) -> (i32, i32) {
    %c0_i32 = arith.constant 0 : i32
    %c0_i32_0 = arith.constant 0 : i32
    %c0_i32_1 = arith.constant 0 : i32
    return %c0_i32, %c0_i32_0 : i32, i32
  }
  func.func @transform_3(%arg0: i32) -> (i32, i32) {
    %c0_i32 = arith.constant 0 : i32
    %c0_i32_0 = arith.constant 0 : i32
    %c0_i32_1 = arith.constant 0 : i32
    return %c0_i32, %c0_i32_0 : i32, i32
  }
  func.func @transform_4(%arg0: i32) -> (i32, i32) {
    %c0_i32 = arith.constant 0 : i32
    %c0_i32_0 = arith.constant 0 : i32
    %c0_i32_1 = arith.constant 0 : i32
    return %c0_i32, %c0_i32_0 : i32, i32
  }
  func.func @transform_5(%arg0: i32) -> (i32, i32) {
    %c0_i32 = arith.constant 0 : i32
    %c0_i32_0 = arith.constant 0 : i32
    %c0_i32_1 = arith.constant 0 : i32
    return %c0_i32, %c0_i32_0 : i32, i32
  }
  func.func @transform_6(%arg0: i32) -> (i32, i32) {
    %c0_i32 = arith.constant 0 : i32
    %c0_i32_0 = arith.constant 0 : i32
    %c0_i32_1 = arith.constant 0 : i32
    return %c0_i32, %c0_i32_0 : i32, i32
  }
  func.func @transform_7(%arg0: i32) -> (i32, i32) {
    %c0_i32 = arith.constant 0 : i32
    %c0_i32_0 = arith.constant 0 : i32
    %c0_i32_1 = arith.constant 0 : i32
    return %c0_i32, %c0_i32_0 : i32, i32
  }
  func.func @transform_8(%arg0: i32) -> (i32, i32, i32) {
    %c0_i32 = arith.constant 0 : i32
    %c0_i32_0 = arith.constant 0 : i32
    %c0_i32_1 = arith.constant 0 : i32
    return %arg0, %c0_i32, %c0_i32_0 : i32, i32, i32
  }
}

</mosaic_0001>

<bundles_post_ra>
// kernel: tpu_custom_call.1
= control target key start
LH: loop header
LB: loop body
LE: loop exit
PB: predicated region body
PF: predicated region fallthrough
CT: control target
= control target key end

     0   :  { %13 = vsyncpa [#allocation4], 0  ;;  %s2061_s0 = inlined_call_operand.vmem [shape: f32[1,8,256], index: 0, kind: input, shape index: {}]   ;;  %s2062_s1 = inlined_call_operand.vmem [shape: f32[32,24], index: 1, kind: input, shape index: {}]   ;;  %s2063_s2 = inlined_call_operand.vmem [shape: f32[32,96], index: 2, kind: input, shape index: {}]   ;;  %s2064_s3 = inlined_call_operand.vmem [shape: f32[32,3], index: 3, kind: input, shape index: {}]   ;;  %s2065_s4 = inlined_call_operand.vmem [shape: f32[2,32], index: 4, kind: input, shape index: {}]   ;;  %s2066_s5 = inlined_call_operand.vmem [shape: f32[32,2], index: 5, kind: input, shape index: {}]   ;;  %s2067_s6 = inlined_call_operand.vmem [shape: f32[32,8], index: 6, kind: input, shape index: {}]   ;;  %s2068_s7 = inlined_call_operand.vmem [shape: f32[2,8], index: 7, kind: input, shape index: {}]   ;;  %s2069_s8 = inlined_call_operand.hbm [shape: f32[1,32,256], index: 8, kind: output, shape index: {}]  }
   0x1   :  { %14 = vsyncpa [#allocation3], 0  ;;  %s35_s29 = sshll.u32 %s2068_s7, 4  ;;  %s36_s29 = int_to_ptr.vmem [resolvable:$true] %s35_s29 }
   0x2   :  { %s1455_s30 = scalar_lea.vmem %s36_s29, 32  ;;  %p1460_p1 = scmp.lt.s32.totalorder %s36_s29, %s36_s29 }
   0x3   :  { %p1456_p0 = scmp.ne.s32.totalorder %s36_s29, %s1455_s30  ;;  %p1461_p2 = scmp.lt.s32.totalorder %s1455_s30, %s1455_s30 }
   0x5   :  { %p1462_p3 = por %p1461_p2, %p1460_p1 }
   0x7   :  { %p1463_p4 = pnand %p1462_p3, %p1456_p0 }
   0x9   :  { %1466 = shalt.err (!%p1463_p4)
}
   0xa   :  { %s1493_s9 = smov [#allocation2]  }
   0xb   :  { %38 = dma.vmem_to_smem %s36_s29, 32, %s1493_s9, [#allocation4]  }
   0xc   :  { %1489 = dma.done.wait [#allocation4], 32  }
   0xd   :  { %1490 = vsyncadd [#allocation4], 4294967264 }
   0xe   :  { %42 = sfence }
   0xf   :  { %v1561_v0 = vld [vmem:[%s2061_s0] sm:$0xff]  ;;  %v1566_v1 = vld [vmem:[%s2061_s0 + $0x8] sm:$0xff]  ;;  %s1494_s13 = smov 127   ;;  %v1495_v3 = vmov 0.0   ;;  %s1496_s14 = smov 1   ;;  %v1497_v6 = vmov 0   ;;  %v43_v9 = vlaneseq }
  0x10   :  { %v1375_v2 = vpack.i.bf16 %v1566_v1, %v1561_v0  ;;  %139 = vrot.lane.b32.xlu1 %v1566_v1, %s1494_s13  ;;  %251 = vmatprep.mubr.f32.mxu1 %v1495_v3  ;;  %v1579_v4 = vld [vmem:[%s2064_s3] sm:$0xff]  ;;  %v1584_v5 = vld [vmem:[%s2064_s3 + $0x8] sm:$0xff]  ;;  %v1593_v7 = vld [vmem:[%s2064_s3 + $0x10] sm:$0xff]  ;;  %vm1498_vm4 = vmmov 1   ;;  %vm174_vm9 = vcmask 195584   ;;  %vm368_vm14 = vcmask 785408  }
  0x11   :  { %1380 = vset.pattern.permute.xlu1 %v1497_v6  ;;  %1381 = vset.pattern.permute.xlu0 %v1497_v6  ;;  %v1599_v8 = vld [vmem:[%s2064_s3 + $0x18] sm:$0xff]  ;;  %v1603_v10 = vand.u32 127, %v43_v9  ;;  %v150_v28 = vld [vmem:[%s2062_s1] sm:$0xff]  ;;  %v151_v29 = vld [vmem:[%s2062_s1 + $0x8] sm:$0xff]  ;;  %vm1501_vm15 = vmmov 0   ;;  %s1504_s28 = smov 2  }
  0x12   :  { %1376 = vrot.lane.b32.xlu0 %v1375_v2, %s1496_s14  ;;  %v152_v30 = vld [vmem:[%s2062_s1 + $0x10] sm:$0xff]  ;;  %v153_v31 = vld [vmem:[%s2062_s1 + $0x18] sm:$0xff]  ;;  %1303 = vmatprep.mubr.msk.f32.mxu0 %vm1501_vm15, %v1495_v3  ;;  %s1505_s1 = smov 126   ;;  %s1506_s29 = smov 125  }
  0x13   :  { %v45_v11 = vadd.s32 128, %v1603_v10  ;;  %v1612_v14 = vadd.s32 4294967295, %v1603_v10  ;;  %vm128_vm1 = vcmp.lt.s32.totalorder %v1603_v10, 1  ;;  %vm141_vm3 = vcmp.lt.s32.totalorder %v1603_v10, 127  ;;  %s1933_s30 = sld [smem:[#allocation2 + $0x3]]  ;;  %s1935_s9 = sld [smem:[#allocation2 + $0x7]] }
  0x14   :  { %156 = vperm.xlu1 %1380, %v1579_v4   ;;  %v1632_v25 = vadd.s32 1, %v1603_v10  ;;  %s1937_s10 = sld [smem:[#allocation2 + $0x80]]  ;;  %s1939_s11 = sld [smem:[#allocation2 + $0x1]] }
  0x15   :  { %v1606_v12 = vand.u32 127, %v45_v11  ;;  %vm88_vm2 = vcmp.ge.s32.totalorder %v1612_v14, 0  ;;  %s1941_s12 = sld [smem:[#allocation2 + $0x81]]  ;;  %s1945_s7 = sld [smem:[#allocation2 + $0x2]] }
  0x16   :  { %137 = vrot.lane.b32.xlu0 %v1561_v0, %s1494_s13  ;;  %vm1318_vm6 = vmpackc.low %vm1498_vm4, %vm88_vm2  ;;  %vm98_vm8 = vcmp.lt.s32.totalorder %v1632_v25, 128  ;;  %s1961_s15 = sld [smem:[#allocation2 + $0x4]]  ;;  %s1989_s0 = sld [smem:[#allocation2 + $0x85]] }
  0x17   :  { %v1609_v13 = vadd.s32 4294967295, %v1606_v12  ;;  %v1618_v18 = vadd.s32 1, %v1606_v12  ;;  %vm1697_vm11 = vmpackc.low %vm88_vm2, %vm88_vm2  ;;  %s1963_s16 = sld [smem:[#allocation2 + $0x84]]  ;;  %s2003_s17 = sld [smem:[#allocation2 + $0x5]] }
  0x18   :  { %166 = vperm.xlu1 %1380, %v1593_v7   ;;  %vm1344_vm13 = vmpackc.low %vm98_vm8, %vm98_vm8  ;;  %s2011_s18 = sld [smem:[#allocation2 + $0x86]]  ;;  %s1507_s20 = smov [#allocation5]  }
  0x19   :  { %vm89_vm0 = vcmp.ge.s32.totalorder %v1609_v13, 0  ;;  %vm99_vm7 = vcmp.lt.s32.totalorder %v1618_v18, 128  ;;  %s2015_s19 = sld [smem:[#allocation2 + $0x6]] }
  0x1a   :  { %161 = vperm.xlu0 %1381, %v1584_v5   ;;  %vm1315_vm5 = vmpackc.low %vm1498_vm4, %vm89_vm0  ;;  %vm511_vm4 = vcmask 7168  }
  0x1b   :  { %vm1690_vm10 = vmpackc.low %vm89_vm0, %vm89_vm0 }
  0x1c   :  { %171 = vperm.xlu1 %1380, %v1599_v8   ;;  %vm1341_vm12 = vmpackc.low %vm99_vm7, %vm99_vm7  ;;  %v996_v25 = vstv %s1989_s0 }
  0x82   :  { %v140_v19 = vpop.permute.xlu1 %139 }
  0x84   :  { %v1377_v15 = vpop.permute.xlu0 %1376 }
  0x85   :  { %v1379_v16 = vunpack.i.h.bf16 %v1377_v15  ;;  %v1378_v17 = vunpack.i.l.bf16 %v1377_v15 }
  0x87   :  { %v129_v20 = vsel %vm128_vm1, %v1378_v17, %v1379_v16  ;;  %v130_v21 = vsel %vm128_vm1, %v1379_v16, %v1378_v17  ;;  %v1499_v17 = vmov 1  }
  0x88   :  { %v1314_v22 = vpack.c.bf16 %v1566_v1, %v129_v20  ;;  %v1317_v23 = vpack.c.bf16 %v1561_v0, %v130_v21  ;;  %v138_v24 = vpop.permute.xlu0 %137  ;;  %1422 = vset.pattern.permute.xlu0 %v1499_v17  ;;  %1423 = vset.pattern.permute.xlu1 %v1499_v17 }
  0x89   :  { %v143_v26 = vsel %vm141_vm3, %v140_v19, %v138_v24  ;;  %v142_v27 = vsel %vm141_vm3, %v138_v24, %v140_v19 }
  0x8a   :  { %1316 = vmatprep.subr.msk.bf16.mxu1 %vm1315_vm5, %v1314_v22  ;;  %vm516_vm5 = vcmask 15360  }
  0x8b   :  { %1319 = vmatpush1.bf16.msk.msra.mxu1 %vm1318_vm6, %v1317_v23  ;;  %vm521_vm6 = vcmask 23552  }
  0x8c   :  { %1235 = vmatprep.subr.msk.mxu1 %vm99_vm7, %v143_v26 }
  0x8f   :  { %1236 = vmatpush1.msk.msra.mxu1 %vm98_vm8, %v142_v27 }
  0x90   :  { %1237 = vmatmul.mubr.msk.f32.vlgmr.msra.gmra.mrb[0].mxu1 %vm174_vm9, %v150_v28 }
  0x91   :  { %257 = vmatprep.mubr.f32.mxu1 %v1495_v3 }
  0x93   :  { %v157_v32 = vpop.permute.xlu1 %156 }
  0x94   :  { %1238 = vmatmul.mubr.msk.f32.gmra.mrb[2].mxu1 %vm174_vm9, %v151_v29 }
  0x95   :  { %263 = vmatprep.mubr.f32.mxu1 %v1495_v3 }
  0x97   :  { %v167_v41 = vpop.permute.xlu1 %166 }
  0x98   :  { %1239 = vmatmul.mubr.msk.f32.gmra.mrb[4].mxu1 %vm174_vm9, %v152_v30 }
  0x99   :  { %269 = vmatprep.mubr.f32.mxu1 %v1495_v3  ;;  %v162_v35 = vpop.permute.xlu0 %161 }
  0x9b   :  { %v172_v54 = vpop.permute.xlu1 %171 }
  0x9c   :  { %1240 = vmatmul.mubr.msk.f32.gmra.mrb[6].mxu1 %vm174_vm9, %v153_v31  ;;  %vm527_vm9 = vcmask 261120  }
  0x9d   :  { %445 = vmatprep.mubr.f32.mxu1 %v1495_v3 }
 0x163   :  { %v253_v33 = vpop.f32.mrb[0].mxu1 }
 0x164   :  { %v255_v34 = vpop.f32.mrb[1].mxu1  ;;  %v254_v36 = vadd.f32 %v253_v33, %v157_v32 }
 0x165   :  { %v256_v37 = vadd.f32 %v255_v34, %v157_v32 }
 0x166   :  { %v276_v43 = vmax.f32 %v254_v36, 0.0 }
 0x167   :  { %v259_v38 = vpop.f32.mrb[2].mxu1  ;;  %v277_v45 = vmax.f32 %v256_v37, 0.0 }
 0x168   :  { %v260_v39 = vadd.f32 %v259_v38, %v162_v35  ;;  %v261_v40 = vpop.f32.mrb[3].mxu1 }
 0x169   :  { %v262_v42 = vadd.f32 %v261_v40, %v162_v35 }
 0x16a   :  { %v278_v44 = vmax.f32 %v260_v39, 0.0 }
 0x16b   :  { %v279_v46 = vmax.f32 %v262_v42, 0.0  ;;  %v265_v47 = vpop.f32.mrb[4].mxu1 }
 0x16c   :  { %v1660_v48 = vpack.c.bf16 %v278_v44, %v276_v43  ;;  %v267_v49 = vpop.f32.mrb[5].mxu1  ;;  %v1382_v50 = vpack.i.bf16 %v278_v44, %v276_v43  ;;  %v266_v53 = vadd.f32 %v265_v47, %v167_v41 }
 0x16d   :  { %v1387_v51 = vpack.i.bf16 %v279_v46, %v277_v45  ;;  %v1662_v52 = vpack.c.bf16 %v279_v46, %v277_v45  ;;  %v268_v55 = vadd.f32 %v267_v49, %v167_v41 }
 0x16e   :  { %1383 = vrot.lane.b32.xlu0 %v1382_v50, %s1496_s14  ;;  %v280_v60 = vmax.f32 %v266_v53, 0.0 }
 0x16f   :  { %v271_v56 = vpop.f32.mrb[6].mxu1  ;;  %1388 = vrot.lane.b32.xlu1 %v1387_v51, %s1496_s14  ;;  %v281_v62 = vmax.f32 %v268_v55, 0.0 }
 0x170   :  { %v272_v57 = vadd.f32 %v271_v56, %v172_v54  ;;  %v273_v58 = vpop.f32.mrb[7].mxu1 }
 0x171   :  { %v274_v59 = vadd.f32 %v273_v58, %v172_v54 }
 0x172   :  { %v282_v61 = vmax.f32 %v272_v57, 0.0 }
 0x173   :  { %v283_v63 = vmax.f32 %v274_v59, 0.0 }
 0x174   :  { %v1666_v2 = vpack.c.bf16 %v282_v61, %v280_v60  ;;  %v1392_v11 = vpack.i.bf16 %v282_v61, %v280_v60 }
 0x175   :  { %v1397_v15 = vpack.i.bf16 %v283_v63, %v281_v62  ;;  %v1336_v16 = vpack.c.bf16 %v283_v63, %v281_v62 }
 0x176   :  { %1393 = vrot.lane.b32.xlu0 %v1392_v11, %s1496_s14 }
 0x177   :  { %1398 = vrot.lane.b32.xlu1 %v1397_v15, %s1496_s14 }
 0x17a   :  { %1403 = vrot.lane.b32.xlu0 %v1382_v50, %s1494_s13 }
 0x17b   :  { %1408 = vrot.lane.b32.xlu1 %v1387_v51, %s1494_s13 }
 0x17e   :  { %1413 = vrot.lane.b32.xlu0 %v1392_v11, %s1494_s13 }
 0x17f   :  { %1418 = vrot.lane.b32.xlu1 %v1397_v15, %s1494_s13 }
 0x182   :  { %353 = vperm.xlu0 %1422, %v1579_v4  }
 0x183   :  { %357 = vperm.xlu1 %1423, %v1584_v5  }
 0x186   :  { %365 = vperm.xlu0 %1422, %v1599_v8  }
 0x187   :  { %361 = vperm.xlu1 %1423, %v1593_v7  }
 0x18a   :  { %1424 = vset.pattern.permute.xlu0 %v1497_v6 }
 0x1e0   :  { %v1384_v19 = vpop.permute.xlu0 %1383 }
 0x1e1   :  { %v1386_v20 = vunpack.i.h.bf16 %v1384_v19  ;;  %v1385_v21 = vunpack.i.l.bf16 %v1384_v19  ;;  %v1389_v22 = vpop.permute.xlu1 %1388 }
 0x1e2   :  { %v1391_v23 = vunpack.i.h.bf16 %v1389_v22  ;;  %v1390_v24 = vunpack.i.l.bf16 %v1389_v22  ;;  %v350_v22 = vld [vmem:[%s2063_s2 + $0x10] sm:$0xff] }
 0x1e4   :  { %v300_v26 = vsel %vm128_vm1, %v1385_v21, %v1390_v24  ;;  %v301_v27 = vsel %vm128_vm1, %v1386_v20, %v1391_v23  ;;  %v304_v28 = vsel %vm128_vm1, %v1390_v24, %v1385_v21  ;;  %v305_v29 = vsel %vm128_vm1, %v1391_v23, %v1386_v20  ;;  %v349_v21 = vld [vmem:[%s2063_s2 + $0x8] sm:$0xff]  ;;  %v351_v23 = vld [vmem:[%s2063_s2 + $0x18] sm:$0xff] }
 0x1e5   :  { %v1320_v31 = vpack.c.bf16 %v301_v27, %v300_v26  ;;  %v1323_v32 = vpack.c.bf16 %v305_v29, %v304_v28 }
 0x1e7   :  { %1322 = vmatprep.subr.msk.bf16.mxu1 %vm1690_vm10, %v1320_v31 }
 0x1e8   :  { %v1394_v34 = vpop.permute.xlu0 %1393  ;;  %1325 = vmatpush1.bf16.msk.msra.mxu1 %vm1697_vm11, %v1323_v32 }
 0x1e9   :  { %v1396_v35 = vunpack.i.h.bf16 %v1394_v34  ;;  %v1395_v36 = vunpack.i.l.bf16 %v1394_v34  ;;  %v1399_v37 = vpop.permute.xlu1 %1398 }
 0x1ea   :  { %v1401_v38 = vunpack.i.h.bf16 %v1399_v37  ;;  %v1400_v39 = vunpack.i.l.bf16 %v1399_v37 }
 0x1ec   :  { %v302_v40 = vsel %vm128_vm1, %v1395_v36, %v1400_v39  ;;  %v303_v41 = vsel %vm128_vm1, %v1396_v35, %v1401_v38  ;;  %v306_v42 = vsel %vm128_vm1, %v1400_v39, %v1395_v36  ;;  %v307_v43 = vsel %vm128_vm1, %v1401_v38, %v1396_v35  ;;  %v1404_v44 = vpop.permute.xlu0 %1403 }
 0x1ed   :  { %v1326_v45 = vpack.c.bf16 %v303_v41, %v302_v40  ;;  %v1329_v46 = vpack.c.bf16 %v307_v43, %v306_v42  ;;  %v1409_v47 = vpop.permute.xlu1 %1408  ;;  %v1406_v49 = vunpack.i.h.bf16 %v1404_v44  ;;  %v1405_v50 = vunpack.i.l.bf16 %v1404_v44 }
 0x1ee   :  { %v1411_v51 = vunpack.i.h.bf16 %v1409_v47  ;;  %v1410_v53 = vunpack.i.l.bf16 %v1409_v47 }
 0x1ef   :  { %1328 = vmatprep.subr.msk.bf16.mxu1 %vm1690_vm10, %v1326_v45  ;;  %v1500_v45 = vmov 0.0|0.0   ;;  %vm618_vm10 = vcmask 1041408  }
 0x1f0   :  { %1331 = vmatpush1.bf16.msk.msra.mxu1 %vm1697_vm11, %v1329_v46  ;;  %v1414_v54 = vpop.permute.xlu0 %1413  ;;  %v336_v56 = vsel %vm141_vm3, %v1410_v53, %v1405_v50  ;;  %v337_v57 = vsel %vm141_vm3, %v1411_v51, %v1406_v49  ;;  %v333_v62 = vsel %vm141_vm3, %v1406_v49, %v1411_v51  ;;  %1352 = vmatprep.subr.bf16.mxu0 %v1500_v45  ;;  %vm1090_vm11 = vcmask 64512  }
 0x1f1   :  { %v1419_v55 = vpop.permute.xlu1 %1418  ;;  %1333 = vmatprep.subr.bf16.mxu1 %v1662_v52  ;;  %v1416_v58 = vunpack.i.h.bf16 %v1414_v54  ;;  %v1415_v59 = vunpack.i.l.bf16 %v1414_v54  ;;  %v332_v52 = vsel %vm141_vm3, %v1405_v50, %v1410_v53  ;;  %v1340_v63 = vpack.c.bf16 %v337_v57, %v336_v56 }
 0x1f2   :  { %v1421_v60 = vunpack.i.h.bf16 %v1419_v55  ;;  %v1420_v61 = vunpack.i.l.bf16 %v1419_v55 }
 0x1f4   :  { %1335 = vmatpush1.bf16.msra.mxu1 %v1660_v48  ;;  %v338_v11 = vsel %vm141_vm3, %v1420_v61, %v1415_v59  ;;  %v339_v15 = vsel %vm141_vm3, %v1421_v60, %v1416_v58  ;;  %v1343_v48 = vpack.c.bf16 %v333_v62, %v332_v52  ;;  %v335_v17 = vsel %vm141_vm3, %v1416_v58, %v1421_v60 }
 0x1f5   :  { %1337 = vmatprep.subr.bf16.mxu1 %v1336_v16  ;;  %v334_v16 = vsel %vm141_vm3, %v1415_v59, %v1420_v61  ;;  %v1346_v19 = vpack.c.bf16 %v339_v15, %v338_v11 }
 0x1f6   :  { %v1349_v20 = vpack.c.bf16 %v335_v17, %v334_v16 }
 0x1f8   :  { %1339 = vmatpush1.bf16.msra.mxu1 %v1666_v2  ;;  %v348_v2 = vld [vmem:[%s2063_s2] sm:$0xff]  ;;  %s1947_s2 = sld [smem:[#allocation2 + $0x82]] }
 0x1f9   :  { %1342 = vmatprep.subr.msk.bf16.mxu1 %vm1341_vm12, %v1340_v63 }
 0x1fc   :  { %1345 = vmatpush1.bf16.msk.msra.mxu1 %vm1344_vm13, %v1343_v48 }
 0x1fd   :  { %1348 = vmatprep.subr.msk.bf16.mxu1 %vm1341_vm12, %v1346_v19  ;;  %vm839_vm12 = vcmask 1040384  }
 0x200   :  { %1351 = vmatpush1.bf16.msk.msra.mxu1 %vm1344_vm13, %v1349_v20  ;;  %vm848_vm13 = vcmp.lt.s32.totalorder %v1603_v10, 3 }
 0x201   :  { %v354_v24 = vpop.permute.xlu0 %353 }
 0x202   :  { %v358_v29 = vpop.permute.xlu1 %357 }
 0x203   :  { %1257 = vmatmul.mubr.msk.f32.vlgmr.msra.gmra.mrb[8].mxu1 %vm368_vm14, %v348_v2 }
 0x204   :  { %451 = vmatprep.mubr.f32.mxu1 %v1495_v3 }
 0x205   :  { %v366_v39 = vpop.permute.xlu0 %365 }
 0x206   :  { %v362_v40 = vpop.permute.xlu1 %361 }
 0x207   :  { %1258 = vmatmul.mubr.msk.f32.gmra.mrb[10].mxu1 %vm368_vm14, %v349_v21 }
 0x208   :  { %457 = vmatprep.mubr.f32.mxu1 %v1495_v3 }
 0x20b   :  { %1259 = vmatmul.mubr.msk.f32.gmra.mrb[12].mxu1 %vm368_vm14, %v350_v22 }
 0x20c   :  { %463 = vmatprep.mubr.f32.mxu1 %v1495_v3 }
 0x20f   :  { %1260 = vmatmul.mubr.msk.f32.gmra.mrb[14].mxu1 %vm368_vm14, %v351_v23 }
 0x2d6   :  { %v447_v26 = vpop.f32.mrb[8].mxu1 }
 0x2d7   :  { %v1757_v27 = vadd.f32 %v447_v26, %v354_v24  ;;  %v449_v28 = vpop.f32.mrb[9].mxu1 }
 0x2d8   :  { %v1761_v31 = vadd.f32 %v449_v28, %v354_v24 }
 0x2d9   :  { %483 = vmax.xlane.f32.xlu0 %v1757_v27  ;;  %470 = vadd.xlane.f32.xlu1 %v1757_v27 }
 0x2da   :  { %v453_v30 = vpop.f32.mrb[10].mxu1 }
 0x2db   :  { %v1763_v32 = vadd.f32 %v453_v30, %v358_v29  ;;  %v455_v33 = vpop.f32.mrb[11].mxu1 }
 0x2dc   :  { %v1767_v35 = vadd.f32 %v455_v33, %v358_v29 }
 0x2dd   :  { %491 = vadd.xlane.f32.xlu0 %v1761_v31  ;;  %485 = vmax.xlane.f32.xlu1 %v1763_v32 }
 0x2de   :  { %v459_v34 = vpop.f32.mrb[12].mxu1 }
 0x2df   :  { %v461_v36 = vpop.f32.mrb[13].mxu1  ;;  %v1773_v41 = vadd.f32 %v459_v34, %v362_v40 }
 0x2e0   :  { %v1781_v43 = vadd.f32 %v461_v36, %v362_v40  ;;  %v602_v40 = vld [vmem:[%s2066_s5] sm:$0xff] }
 0x2e1   :  { %503 = vmax.xlane.f32.xlu0 %v1761_v31  ;;  %493 = vadd.xlane.f32.xlu1 %v1767_v35 }
 0x2e2   :  { %v465_v37 = vpop.f32.mrb[14].mxu1 }
 0x2e3   :  { %v467_v38 = vpop.f32.mrb[15].mxu1  ;;  %v1775_v42 = vadd.f32 %v465_v37, %v366_v39 }
 0x2e4   :  { %v1783_v44 = vadd.f32 %v467_v38, %v366_v39  ;;  %v526_v39 = vld [vmem:[%s2065_s4] sm:$0x3]  ;;  %s1221_s4 = sshll.u32 %s1507_s20, 4  ;;  %s2042_s4 = int_to_ptr.vmem [resolvable:$true] %s1221_s4 }
 0x2e5   :  { %472 = vadd.xlane.f32.xlu0 %v1763_v32  ;;  %505 = vmax.xlane.f32.xlu1 %v1767_v35  ;;  %s1467_s21 = scalar_lea.vmem %s2042_s4, 1024  ;;  %p1472_p6 = scmp.lt.s32.totalorder %s2042_s4, %s2042_s4 }
 0x2e6   :  { %p1468_p5 = scmp.ne.s32.totalorder %s2042_s4, %s1467_s21  ;;  %p1473_p7 = scmp.lt.s32.totalorder %s1467_s21, %s1467_s21 }
 0x2e8   :  { %p1474_p8 = por %p1473_p7, %p1472_p6 }
 0x2e9   :  { %474 = vadd.xlane.f32.xlu0 %v1773_v41  ;;  %476 = vadd.xlane.f32.xlu1 %v1775_v42 }
 0x2ea   :  { %p1475_p9 = pnand %p1474_p8, %p1468_p5 }
 0x2ed   :  { %487 = vmax.xlane.f32.xlu0 %v1773_v41  ;;  %489 = vmax.xlane.f32.xlu1 %v1775_v42 }
 0x2f1   :  { %495 = vadd.xlane.f32.xlu0 %v1781_v43  ;;  %497 = vadd.xlane.f32.xlu1 %v1783_v44 }
 0x2f5   :  { %507 = vmax.xlane.f32.xlu0 %v1781_v43  ;;  %509 = vmax.xlane.f32.xlu1 %v1783_v44 }
 0x366   :  { %v484_v46 = vpop.xlane.xlu0 %483  ;;  %v471_v47 = vpop.xlane.xlu1 %470 }
 0x367   :  { %v479_v54 = vmul.f32 0.0078125, %v471_v47 }
 0x369   :  { %v512_v58 = vsel %vm511_vm4, %v479_v54, %v484_v46 }
 0x36a   :  { %v492_v49 = vpop.xlane.xlu0 %491  ;;  %v486_v50 = vpop.xlane.xlu1 %485 }
 0x36b   :  { %v499_v55 = vmul.f32 0.0078125, %v492_v49  ;;  %v603_v49 = vld [vmem:[%s2066_s5 + $0x8] sm:$0xff] }
 0x36d   :  { %v517_v60 = vsel %vm516_vm5, %v512_v58, %v499_v55  ;;  %v1072_v58 = vld [vmem:[%s2067_s6 + $0x10] sm:$0xff] }
 0x36e   :  { %v504_v51 = vpop.xlane.xlu0 %503  ;;  %v494_v53 = vpop.xlane.xlu1 %493 }
 0x36f   :  { %v500_v61 = vmul.f32 0.0078125, %v494_v53  ;;  %v522_v15 = vsel %vm521_vm6, %v517_v60, %v504_v51  ;;  %v605_v51 = vld [vmem:[%s2066_s5 + $0x18] sm:$0xff] }
 0x372   :  { %v473_v56 = vpop.xlane.xlu0 %472  ;;  %v506_v57 = vpop.xlane.xlu1 %505 }
 0x373   :  { %v480_v59 = vmul.f32 0.0078125, %v473_v56  ;;  %v1502_v56 = vmov 2  }
 0x374   :  { %1425 = vset.pattern.permute.xlu1 %v1502_v56 }
 0x375   :  { %v513_v52 = vsel %vm511_vm4, %v480_v59, %v486_v50  ;;  %v604_v50 = vld [vmem:[%s2066_s5 + $0x10] sm:$0xff]  ;;  %v1073_v59 = vld [vmem:[%s2067_s6 + $0x18] sm:$0xff] }
 0x376   :  { %v518_v62 = vsel %vm516_vm5, %v513_v52, %v500_v61  ;;  %v475_v63 = vpop.xlane.xlu0 %474  ;;  %v477_v11 = vpop.xlane.xlu1 %476 }
 0x377   :  { %v523_v48 = vsel %vm521_vm6, %v518_v62, %v506_v57  ;;  %v481_v20 = vmul.f32 0.0078125, %v475_v63  ;;  %v482_v2 = vmul.f32 0.0078125, %v477_v11  ;;  %v1071_v57 = vld [vmem:[%s2067_s6 + $0x8] sm:$0xff] }
 0x378   :  { %v1353_v16 = vpack.c.bf16 %v523_v48, %v522_v15 }
 0x37a   :  { %v488_v17 = vpop.xlane.xlu0 %487  ;;  %1354 = vmatpush3.bf16.msra.mxu0 %v1353_v16  ;;  %v490_v19 = vpop.xlane.xlu1 %489 }
 0x37b   :  { %1355 = vmatprep.subr.bf16.mxu0 %v1500_v45  ;;  %v514_v26 = vsel %vm511_vm4, %v481_v20, %v488_v17  ;;  %v515_v28 = vsel %vm511_vm4, %v482_v2, %v490_v19  ;;  %vm879_vm4 = vcmp.lt.s32.totalorder %v1603_v10, 2 }
 0x37e   :  { %v496_v21 = vpop.xlane.xlu0 %495  ;;  %v498_v22 = vpop.xlane.xlu1 %497 }
 0x37f   :  { %v501_v23 = vmul.f32 0.0078125, %v496_v21  ;;  %v502_v24 = vmul.f32 0.0078125, %v498_v22 }
 0x381   :  { %v519_v29 = vsel %vm516_vm5, %v514_v26, %v501_v23  ;;  %v520_v30 = vsel %vm516_vm5, %v515_v28, %v502_v24 }
 0x382   :  { %v508_v33 = vpop.xlane.xlu0 %507  ;;  %v510_v34 = vpop.xlane.xlu1 %509 }
 0x383   :  { %v524_v36 = vsel %vm521_vm6, %v519_v29, %v508_v33  ;;  %v525_v37 = vsel %vm521_vm6, %v520_v30, %v510_v34 }
 0x384   :  { %v1356_v38 = vpack.c.bf16 %v525_v37, %v524_v36 }
 0x386   :  { %1357 = vmatpush3.bf16.msra.mxu0 %v1356_v38 }
 0x389   :  { %1304 = vmatmul.mubr.msk.f32.vlgmr.msra.gmra.mrb[0].mxu0 %vm527_vm9, %v526_v39 }
 0x38a   :  { %1308 = vmatprep.mubr.msk.f32.mxu0 %vm516_vm5, %v602_v40 }
 0x45c   :  { %v597_v45 = vpop.f32.mrb[0].mxu0 }
 0x45d   :  { %v601_v46 = vmax.f32 %v597_v45, 0.0  ;;  %v1305_v47 = vpop.f32.mrb[1].mxu0 }
 0x45f   :  { %1306 = vmatprep.subr.msk.mxu0 %vm618_vm10, %v601_v46 }
 0x460   :  { %1307 = vmatpush3.msk.msra.mxu0 %vm618_vm10, %v601_v46 }
 0x461   :  { %1309 = vmatmul.mubr.msk.f32.vlgmr.msra.gmra.mrb[2].mxu0 %vm516_vm5, %v603_v49  ;;  %1103 = vmatprep.subr.mxu0 %v1566_v1 }
 0x462   :  { %1311 = vmatprep.mubr.msk.f32.mxu0 %vm516_vm5, %v604_v50  ;;  %1104 = vmatpush1.msra.mxu0 %v1561_v0  ;;  %v1070_v0 = vld [vmem:[%s2067_s6] sm:$0xff]  ;;  %s1503_s6 = smov 3  }
 0x465   :  { %1312 = vmatmul.mubr.msk.f32.gmra.mrb[4].mxu0 %vm516_vm5, %v605_v51 }
 0x466   :  { %1167 = vmatprep.mubr.f32.mxu0 %v1495_v3 }
 0x469   :  { %1281 = vmatmul.mubr.msk.f32.vlgmr.msra.gmra.mrb[6].mxu0 %vm1090_vm11, %v1070_v0 }
 0x46a   :  { %1173 = vmatprep.mubr.f32.mxu0 %v1495_v3 }
 0x46d   :  { %1282 = vmatmul.mubr.msk.f32.gmra.mrb[8].mxu0 %vm1090_vm11, %v1071_v57 }
 0x46e   :  { %1179 = vmatprep.mubr.f32.mxu0 %v1495_v3 }
 0x471   :  { %1283 = vmatmul.mubr.msk.f32.gmra.mrb[10].mxu0 %vm1090_vm11, %v1072_v58 }
 0x472   :  { %1185 = vmatprep.mubr.f32.mxu0 %v1495_v3 }
 0x475   :  { %1284 = vmatmul.mubr.msk.f32.gmra.mrb[12].mxu0 %vm1090_vm11, %v1073_v59 }
 0x534   :  { %v1310_v53 = vpop.f32.mrb[2].mxu0 }
 0x535   :  { %713 = vrot.lane.b32.xlu1 %v1310_v53, %s1494_s13  ;;  %v688_v54 = vpop.f32.mrb[3].mxu0 }
 0x536   :  { %711 = vrot.lane.b32.xlu0 %v688_v54, %s1494_s13 }
 0x538   :  { %v1313_v55 = vpop.f32.mrb[4].mxu0 }
 0x539   :  { %v698_v1 = vpop.f32.mrb[5].mxu0 }
 0x53a   :  { %717 = vrot.lane.b32.xlu0 %v1313_v55, %s1494_s13  ;;  %715 = vrot.lane.b32.xlu1 %v698_v1, %s1494_s13 }
 0x5a7   :  { %v714_v60 = vpop.permute.xlu1 %713 }
 0x5a8   :  { %v724_v61 = vadd.f32 %v1310_v53, %v714_v60  ;;  %v712_v52 = vpop.permute.xlu0 %711 }
 0x5a9   :  { %v723_v62 = vadd.f32 %v712_v52, %v688_v54 }
 0x5aa   :  { %v728_v63 = vsub.f32 0.0, %v724_v61 }
 0x5ab   :  { %v727_v11 = vsub.f32 0.0, %v723_v62 }
 0x5ac   :  { %v733_v15 = vmul.f32 1.442695, %v728_v63  ;;  %v718_v48 = vpop.permute.xlu0 %717  ;;  %v716_v16 = vpop.permute.xlu1 %715 }
 0x5ad   :  { %v731_v17 = vmul.f32 1.442695, %v727_v11  ;;  %v726_v19 = vadd.f32 %v1313_v55, %v718_v48  ;;  %v725_v20 = vadd.f32 %v716_v16, %v698_v1 }
 0x5ae   :  { %1431 = vpow2.f32 %v733_v15 }
 0x5af   :  { %1433 = vpow2.f32 %v731_v17  ;;  %v730_v3 = vsub.f32 0.0, %v726_v19  ;;  %v729_v2 = vsub.f32 0.0, %v725_v20 }
 0x5b1   :  { %v737_v21 = vmul.f32 1.442695, %v730_v3  ;;  %v735_v22 = vmul.f32 1.442695, %v729_v2 }
 0x5b3   :  { %1435 = vpow2.f32 %v737_v21 }
 0x5b4   :  { %1437 = vpow2.f32 %v735_v22 }
 0x5b8   :  { %v1432_v23 = vpop.eup %1431 }
 0x5b9   :  { %v1434_v24 = vpop.eup %1433  ;;  %v740_v26 = vadd.f32 1.0, %v1432_v23 }
 0x5ba   :  { %v739_v28 = vadd.f32 1.0, %v1434_v24 }
 0x5bb   :  { %1439 = vrcp.f32 %v740_v26 }
 0x5bc   :  { %1441 = vrcp.f32 %v739_v28 }
 0x5bd   :  { %v1436_v29 = vpop.eup %1435 }
 0x5be   :  { %v1438_v30 = vpop.eup %1437  ;;  %v742_v34 = vadd.f32 1.0, %v1436_v29 }
 0x5bf   :  { %v741_v33 = vadd.f32 1.0, %v1438_v30 }
 0x5c1   :  { %1443 = vrcp.f32 %v741_v33 }
 0x5c2   :  { %1445 = vrcp.f32 %v742_v34 }
 0x5c5   :  { %v1440_v36 = vpop.eup %1439 }
 0x5c6   :  { %v1442_v37 = vpop.eup %1441  ;;  %v748_v38 = vmul.f32 %v1440_v36, %v740_v26 }
 0x5c7   :  { %v747_v39 = vmul.f32 %v1442_v37, %v739_v28 }
 0x5c8   :  { %v752_v40 = vsub.f32 2.0, %v748_v38 }
 0x5c9   :  { %v751_v47 = vsub.f32 2.0, %v747_v39 }
 0x5ca   :  { %v756_v45 = vmul.f32 %v1440_v36, %v752_v40 }
 0x5cb   :  { %v1444_v46 = vpop.eup %1443  ;;  %v755_v53 = vmul.f32 %v1442_v37, %v751_v47 }
 0x5cc   :  { %766 = vperm.xlu0 %1424, %v756_v45   ;;  %784 = vperm.xlu1 %1425, %v756_v45   ;;  %v749_v49 = vmul.f32 %v1444_v46, %v741_v33  ;;  %v1446_v50 = vpop.eup %1445 }
 0x5cd   :  { %v750_v55 = vmul.f32 %v1446_v50, %v742_v34 }
 0x5ce   :  { %v753_v51 = vsub.f32 2.0, %v749_v49 }
 0x5cf   :  { %v754_v1 = vsub.f32 2.0, %v750_v55 }
 0x5d0   :  { %1426 = vset.pattern.permute.xlu1 %v1497_v6  ;;  %v757_v54 = vmul.f32 %v1444_v46, %v753_v51 }
 0x5d1   :  { %761 = vperm.xlu1 %1426, %v755_v53   ;;  %v758_v0 = vmul.f32 %v1446_v50, %v754_v1 }
 0x5d2   :  { %771 = vperm.xlu0 %1424, %v757_v54  }
 0x5d5   :  { %1427 = vset.pattern.permute.xlu1 %v1502_v56 }
 0x5d6   :  { %1429 = vset.pattern.permute.xlu0 %v1502_v56  ;;  %780 = vperm.xlu1 %1427, %v755_v53  }
 0x5d7   :  { %788 = vperm.xlu0 %1429, %v757_v54  }
 0x5da   :  { %1428 = vset.pattern.permute.xlu1 %v1497_v6 }
 0x5db   :  { %776 = vperm.xlu1 %1428, %v758_v0  }
 0x5df   :  { %1430 = vset.pattern.permute.xlu1 %v1502_v56 }
 0x5e0   :  { %792 = vperm.xlu1 %1430, %v758_v0  }
 0x64b   :  { %v785_v57 = vpop.permute.xlu1 %784  ;;  %v767_v58 = vpop.permute.xlu0 %766 }
 0x64c   :  { %v1853_v61 = vmul.f32 %v767_v58, %v1763_v32  ;;  %v1864_v11 = vmul.f32 %v785_v57, %v1767_v35  ;;  %v1910_v58 = vpop.f32.mrb[6].mxu0 }
 0x650   :  { %v762_v59 = vpop.permute.xlu1 %761 }
 0x651   :  { %v1850_v60 = vmul.f32 %v762_v59, %v1757_v27  ;;  %v772_v52 = vpop.permute.xlu0 %771  ;;  %v1912_v59 = vpop.f32.mrb[7].mxu0 }
 0x652   :  { %v1861_v56 = vmul.f32 %v772_v52, %v1773_v41  ;;  %v1914_v52 = vpop.f32.mrb[8].mxu0 }
 0x653   :  { %v803_v63 = vadd.f32 %v1853_v61, %v1850_v60 }
 0x655   :  { %v781_v62 = vpop.permute.xlu1 %780  ;;  %v804_v48 = vadd.f32 %v803_v63, %v1861_v56 }
 0x656   :  { %v1858_v6 = vmul.f32 %v781_v62, %v1761_v31  ;;  %v789_v27 = vpop.permute.xlu0 %788  ;;  %v821_v31 = vmax.f32 %v1850_v60, %v1861_v56  ;;  %v1917_v62 = vpop.f32.mrb[9].mxu0 }
 0x657   :  { %v1878_v35 = vmul.f32 %v789_v27, %v1781_v43  ;;  %v1920_v63 = vpop.f32.mrb[10].mxu0 }
 0x658   :  { %v812_v16 = vadd.f32 %v1864_v11, %v1858_v6 }
 0x659   :  { %v830_v23 = vmax.f32 %v1858_v6, %v1878_v35 }
 0x65a   :  { %v777_v15 = vpop.permute.xlu1 %776 }
 0x65b   :  { %v1868_v32 = vmul.f32 %v777_v15, %v1775_v42  ;;  %v813_v42 = vadd.f32 %v812_v16, %v1878_v35  ;;  %v1922_v15 = vpop.f32.mrb[11].mxu0  ;;  %v79_v16 = vadd.s32 4294967294, %v1606_v12 }
 0x65d   :  { %v805_v17 = vadd.f32 %v804_v48, %v1868_v32  ;;  %v822_v41 = vmax.f32 %v1853_v61, %v1868_v32  ;;  %v78_v48 = vadd.s32 4294967294, %v1603_v10  ;;  %vm81_vm6 = vcmp.ge.s32.totalorder %v79_v16, 0 }
 0x65f   :  { %v806_v19 = vrot.slane %v805_v17, 4  ;;  %v823_v20 = vmax.f32 %v821_v31, %v822_v41  ;;  %v793_v3 = vpop.permute.xlu1 %792  ;;  %vm80_vm5 = vcmp.ge.s32.totalorder %v78_v48, 0 }
 0x660   :  { %v1882_v2 = vmul.f32 %v793_v3, %v1783_v44  ;;  %v864_v3 = vstv %s1937_s10 }
 0x661   :  { %v807_v21 = vadd.f32 %v806_v19, %v805_v17  ;;  %v824_v22 = vrot.slane %v823_v20, 4  ;;  %v933_v19 = vstv %s1933_s30 }
 0x662   :  { %v814_v24 = vadd.f32 %v813_v42, %v1882_v2  ;;  %v831_v26 = vmax.f32 %v1864_v11, %v1882_v2 }
 0x663   :  { %v808_v43 = vrot.slane %v807_v21, 2  ;;  %v825_v28 = vmax.f32 %v823_v20, %v824_v22  ;;  %v843_v20 = vstv %s1935_s9 }
 0x664   :  { %v815_v29 = vrot.slane %v814_v24, 4  ;;  %v832_v30 = vmax.f32 %v830_v23, %v831_v26 }
 0x665   :  { %v809_v33 = vadd.f32 %v808_v43, %v807_v21  ;;  %v826_v34 = vrot.slane %v825_v28, 2  ;;  %v889_v43 = vstv %s1939_s11 }
 0x666   :  { %v816_v36 = vadd.f32 %v815_v29, %v814_v24  ;;  %v833_v37 = vrot.slane %v832_v30, 4 }
 0x667   :  { %v810_v44 = vrot.slane %v809_v33, 1  ;;  %v827_v38 = vmax.f32 %v825_v28, %v826_v34  ;;  %v895_v28 = vstv %s1941_s12 }
 0x668   :  { %v817_v39 = vrot.slane %v816_v36, 2  ;;  %v834_v40 = vmax.f32 %v832_v30, %v833_v37 }
 0x669   :  { %v828_v45 = vrot.slane %v827_v38, 1  ;;  %v811_v49 = vadd.f32 %v810_v44, %v809_v33  ;;  %v915_v44 = vstv %s1945_s7 }
 0x66a   :  { %v818_v46 = vadd.f32 %v817_v39, %v816_v36  ;;  %v835_v47 = vrot.slane %v834_v40, 2 }
 0x66b   :  { %v829_v50 = vmax.f32 %v827_v38, %v828_v45  ;;  %v921_v38 = vstv %s1947_s2 }
 0x66c   :  { %v819_v51 = vrot.slane %v818_v46, 1  ;;  %v836_v53 = vmax.f32 %v834_v40, %v835_v47 }
 0x66d   :  { %v1889_v54 = vsel %vm839_vm12, %v811_v49, %v829_v50 }
 0x66e   :  { %v837_v55 = vrot.slane %v836_v53, 1  ;;  %844 = vrot.lane.b32.xlu1 %v1889_v54, %s1503_s6  ;;  %v820_v1 = vadd.f32 %v819_v51, %v818_v46  ;;  %v1970_v39 = vmul.f32 %v933_v19, %v1889_v54 }
 0x670   :  { %v838_v0 = vmax.f32 %v836_v53, %v837_v55 }
 0x672   :  { %875 = vrot.lane.b32.xlu1 %v1889_v54, %s1504_s28  ;;  %v1893_v57 = vsel %vm839_vm12, %v820_v1, %v838_v0 }
 0x673   :  { %846 = vrot.lane.b32.xlu0 %v1893_v57, %s1503_s6  ;;  %v935_v53 = vmul.f32 %v933_v19, %v1893_v57 }
 0x676   :  { %906 = vrot.lane.b32.xlu1 %v1889_v54, %s1496_s14 }
 0x677   :  { %877 = vrot.lane.b32.xlu0 %v1893_v57, %s1504_s28 }
 0x67a   :  { %950 = vrot.lane.b32.xlu1 %v1889_v54, %s1494_s13 }
 0x67b   :  { %908 = vrot.lane.b32.xlu0 %v1893_v57, %s1496_s14  ;;  %s1931_s14 = sld [smem:[#allocation2]] }
 0x67e   :  { %976 = vrot.lane.b32.xlu1 %v1889_v54, %s1505_s1 }
 0x67f   :  { %952 = vrot.lane.b32.xlu0 %v1893_v57, %s1494_s13  ;;  %s1929_s13 = sld [smem:[#allocation2 + $0x83]] }
 0x681   :  { %v858_v41 = vstv %s1931_s14 }
 0x682   :  { %1007 = vrot.lane.b32.xlu1 %v1889_v54, %s1506_s29 }
 0x683   :  { %978 = vrot.lane.b32.xlu0 %v1893_v57, %s1505_s1 }
 0x685   :  { %v939_v31 = vstv %s1929_s13 }
 0x686   :  { %1075 = vperm.xlu1 %1430, %v1579_v4   ;;  %v1925_v4 = vpop.f32.mrb[12].mxu0  ;;  %v1959_v21 = vmul.f32 %v939_v31, %v1889_v54  ;;  %v1979_v55 = vmul.f32 %v939_v31, %v1893_v57  ;;  %v965_v31 = vstv %s1963_s16 }
 0x687   :  { %1009 = vrot.lane.b32.xlu0 %v1893_v57, %s1506_s29  ;;  %v1927_v27 = vpop.f32.mrb[13].mxu0  ;;  %v959_v57 = vstv %s1961_s15 }
 0x688   :  { %v944_v40 = vrot.slane %v1959_v21, 1 }
 0x68a   :  { %1083 = vperm.xlu1 %1430, %v1593_v7   ;;  %v70_v7 = vadd.s32 4294967293, %v1603_v10 }
 0x68b   :  { %1079 = vperm.xlu0 %1429, %v1584_v5  }
 0x68c   :  { %vm72_vm14 = vcmp.ge.s32.totalorder %v70_v7, 0 }
 0x68f   :  { %1087 = vperm.xlu0 %1429, %v1599_v8   ;;  %v71_v8 = vadd.s32 4294967293, %v1606_v12 }
 0x691   :  { %vm73_vm15 = vcmp.ge.s32.totalorder %v71_v8, 0 }
 0x6e0   :  { %v845_v5 = vpop.permute.xlu1 %844 }
 0x6e4   :  { %v876_v17 = vpop.permute.xlu1 %875 }
 0x6e5   :  { %v847_v42 = vpop.permute.xlu0 %846 }
 0x6e6   :  { %v849_v22 = vsel %vm848_vm13, %v845_v5, %v847_v42  ;;  %v850_v23 = vsel %vm848_vm13, %v847_v42, %v845_v5 }
 0x6e7   :  { %v855_v24 = vsel %vm72_vm14, %v850_v23, 0.0  ;;  %v856_v26 = vsel %vm73_vm15, %v849_v22, 0.0 }
 0x6e8   :  { %v859_v29 = vmul.f32 %v858_v41, %v855_v24  ;;  %v860_v30 = vmul.f32 %v858_v41, %v856_v26  ;;  %v865_v33 = vmul.f32 %v864_v3, %v855_v24  ;;  %v866_v34 = vmul.f32 %v864_v3, %v856_v26  ;;  %v907_v36 = vpop.permute.xlu1 %906 }
 0x6e9   :  { %v878_v37 = vpop.permute.xlu0 %877 }
 0x6ea   :  { %v861_v45 = vadd.f32 %v859_v29, %v843_v20  ;;  %v862_v46 = vadd.f32 %v860_v30, %v843_v20  ;;  %v869_v47 = vrot.slane %v865_v33, 1  ;;  %v870_v49 = vrot.slane %v866_v34, 1 }
 0x6eb   :  { %v880_v50 = vsel %vm879_vm4, %v876_v17, %v878_v37  ;;  %v881_v51 = vsel %vm879_vm4, %v878_v37, %v876_v17 }
 0x6ec   :  { %v873_v54 = vadd.f32 %v869_v47, %v861_v45  ;;  %v874_v1 = vadd.f32 %v870_v49, %v862_v46  ;;  %v886_v0 = vsel %vm80_vm5, %v881_v51, 0.0  ;;  %v887_v5 = vsel %vm81_vm6, %v880_v50, 0.0  ;;  %v951_v3 = vpop.permute.xlu1 %950 }
 0x6ed   :  { %v890_v7 = vmul.f32 %v889_v43, %v886_v0  ;;  %v891_v8 = vmul.f32 %v889_v43, %v887_v5  ;;  %v896_v41 = vmul.f32 %v895_v28, %v886_v0  ;;  %v897_v20 = vmul.f32 %v895_v28, %v887_v5  ;;  %v909_v42 = vpop.permute.xlu0 %908 }
 0x6ee   :  { %v910_v17 = vsel %vm128_vm1, %v907_v36, %v909_v42  ;;  %v911_v19 = vsel %vm128_vm1, %v909_v42, %v907_v36  ;;  %v102_v43 = vadd.s32 2, %v1603_v10  ;;  %v103_v28 = vadd.s32 2, %v1606_v12 }
 0x6ef   :  { %v892_v22 = vadd.f32 %v890_v7, %v873_v54  ;;  %v893_v23 = vadd.f32 %v891_v8, %v874_v1  ;;  %v900_v48 = vrot.slane %v896_v41, 1  ;;  %v901_v24 = vrot.slane %v897_v20, 1 }
 0x6f0   :  { %v912_v16 = vsel %vm88_vm2, %v911_v19, 0.0  ;;  %v913_v26 = vsel %vm89_vm0, %v910_v17, 0.0  ;;  %v977_v49 = vpop.permute.xlu1 %976  ;;  %v945_v50 = vrot.slane %v1979_v55, 1  ;;  %vm980_vm0 = vcmp.lt.s32.totalorder %v1603_v10, 126 }
 0x6f1   :  { %v904_v29 = vadd.f32 %v900_v48, %v892_v22  ;;  %v905_v30 = vadd.f32 %v901_v24, %v893_v23  ;;  %v916_v33 = vmul.f32 %v915_v44, %v912_v16  ;;  %v917_v34 = vmul.f32 %v915_v44, %v913_v26  ;;  %v953_v36 = vpop.permute.xlu0 %952 }
 0x6f2   :  { %v922_v37 = vmul.f32 %v921_v38, %v912_v16  ;;  %v923_v45 = vmul.f32 %v921_v38, %v913_v26  ;;  %v954_v46 = vsel %vm141_vm3, %v951_v3, %v953_v36  ;;  %v955_v14 = vsel %vm141_vm3, %v953_v36, %v951_v3 }
 0x6f3   :  { %v918_v47 = vadd.f32 %v916_v33, %v904_v29  ;;  %v919_v13 = vadd.f32 %v917_v34, %v905_v30  ;;  %v956_v38 = vsel %vm98_vm8, %v954_v46, 0.0  ;;  %v957_v54 = vsel %vm99_vm7, %v955_v14, 0.0 }
 0x6f4   :  { %v926_v51 = vrot.slane %v922_v37, 1  ;;  %v927_v44 = vrot.slane %v923_v45, 1  ;;  %vm106_vm1 = vcmp.lt.s32.totalorder %v102_v43, 128  ;;  %vm107_vm2 = vcmp.lt.s32.totalorder %v103_v28, 128  ;;  %v1008_v23 = vpop.permute.xlu1 %1007 }
 0x6f5   :  { %v979_v1 = vpop.permute.xlu0 %978  ;;  %v110_v0 = vadd.s32 3, %v1603_v10  ;;  %v111_v55 = vadd.s32 3, %v1606_v12  ;;  %v966_v20 = vmul.f32 %v965_v31, %v956_v38  ;;  %v967_v3 = vmul.f32 %v965_v31, %v957_v54 }
 0x6f6   :  { %v930_v5 = vadd.f32 %v926_v51, %v918_v47  ;;  %v931_v7 = vadd.f32 %v927_v44, %v919_v13  ;;  %v981_v8 = vsel %vm980_vm0, %v977_v49, %v979_v1  ;;  %v982_v41 = vsel %vm980_vm0, %v979_v1, %v977_v49 }
 0x6f7   :  { %vm1011_vm3 = vcmp.lt.s32.totalorder %v1603_v10, 125  ;;  %v987_v17 = vsel %vm106_vm1, %v981_v8, 0.0  ;;  %v988_v12 = vsel %vm107_vm2, %v982_v41, 0.0  ;;  %v960_v19 = vmul.f32 %v959_v57, %v956_v38 }
 0x6f8   :  { %v936_v18 = vadd.f32 %v1970_v39, %v930_v5  ;;  %v937_v42 = vadd.f32 %v935_v53, %v931_v7  ;;  %v961_v22 = vmul.f32 %v959_v57, %v957_v54  ;;  %vm114_vm7 = vcmp.lt.s32.totalorder %v110_v0, 128 }
 0x6f9   :  { %vm115_vm8 = vcmp.lt.s32.totalorder %v111_v55, 128  ;;  %v1010_v31 = vpop.permute.xlu0 %1009  ;;  %v990_v26 = vstv %s2003_s17  ;;  %v997_v39 = vmul.f32 %v996_v25, %v987_v17  ;;  %v998_v53 = vmul.f32 %v996_v25, %v988_v12 }
 0x6fa   :  { %v948_v10 = vadd.f32 %v944_v40, %v936_v18  ;;  %v949_v48 = vadd.f32 %v945_v50, %v937_v42  ;;  %v1012_v24 = vsel %vm1011_vm3, %v1008_v23, %v1010_v31  ;;  %v1013_v16 = vsel %vm1011_vm3, %v1010_v31, %v1008_v23 }
 0x6fb   :  { %v970_v29 = vrot.slane %v966_v20, 1  ;;  %v971_v30 = vrot.slane %v967_v3, 1  ;;  %v1027_v57 = vstv %s2011_s18  ;;  %v1018_v33 = vsel %vm114_vm7, %v1012_v24, 0.0 }
 0x6fc   :  { %v962_v43 = vadd.f32 %v960_v19, %v948_v10  ;;  %v963_v28 = vadd.f32 %v961_v22, %v949_v48  ;;  %v1019_v34 = vsel %vm115_vm8, %v1013_v16, 0.0  ;;  %v991_v45 = vmul.f32 %v990_v26, %v987_v17 }
 0x6fd   :  { %v992_v46 = vmul.f32 %v990_v26, %v988_v12  ;;  %v1001_v21 = vrot.slane %v997_v39, 1  ;;  %v1002_v40 = vrot.slane %v998_v53, 1  ;;  %v1021_v14 = vstv %s2015_s19 }
 0x6fe   :  { %v974_v36 = vadd.f32 %v970_v29, %v962_v43  ;;  %v975_v37 = vadd.f32 %v971_v30, %v963_v28  ;;  %v1028_v49 = vmul.f32 %v1027_v57, %v1018_v33  ;;  %v1029_v50 = vmul.f32 %v1027_v57, %v1019_v34 }
 0x6ff   :  { %v1022_v38 = vmul.f32 %v1021_v14, %v1018_v33  ;;  %v1023_v54 = vmul.f32 %v1021_v14, %v1019_v34  ;;  %v1055_v22 = vshrl.u32 %v43_v9, 7 }
 0x700   :  { %v993_v47 = vadd.f32 %v991_v45, %v974_v36  ;;  %v994_v13 = vadd.f32 %v992_v46, %v975_v37  ;;  %v1032_v55 = vrot.slane %v1028_v49, 1  ;;  %v1033_v5 = vrot.slane %v1029_v50, 1 }
 0x701   :  { %v1056_v26 = vsub.s32 0, %v1055_v22 }
 0x702   :  { %v1005_v51 = vadd.f32 %v1001_v21, %v993_v47  ;;  %v1006_v44 = vadd.f32 %v1002_v40, %v994_v13 }
 0x704   :  { %v1024_v1 = vadd.f32 %v1022_v38, %v1005_v51  ;;  %v1025_v0 = vadd.f32 %v1023_v54, %v1006_v44 }
 0x705   :  { %v1076_v19 = vpop.permute.xlu1 %1075 }
 0x706   :  { %v1036_v7 = vadd.f32 %v1032_v55, %v1024_v1  ;;  %v1037_v8 = vadd.f32 %v1033_v5, %v1025_v0  ;;  %v1170_v29 = vadd.f32 %v1910_v58, %v1076_v19  ;;  %v1172_v57 = vadd.f32 %v1912_v59, %v1076_v19 }
 0x708   :  { %v1038_v41 = vsub.f32 0.0, %v1036_v7  ;;  %v1039_v20 = vsub.f32 0.0, %v1037_v8 }
 0x709   :  { %v1084_v53 = vpop.permute.xlu1 %1083 }
 0x70a   :  { %v1040_v3 = vmul.f32 1.442695, %v1038_v41  ;;  %v1042_v25 = vmul.f32 1.442695, %v1039_v20  ;;  %v1080_v23 = vpop.permute.xlu0 %1079  ;;  %v1182_v34 = vadd.f32 %v1920_v63, %v1084_v53  ;;  %v1184_v9 = vadd.f32 %v1922_v15, %v1084_v53 }
 0x70b   :  { %v1176_v36 = vadd.f32 %v1914_v52, %v1080_v23  ;;  %v1178_v45 = vadd.f32 %v1917_v62, %v1080_v23 }
 0x70c   :  { %1447 = vpow2.f32 %v1040_v3 }
 0x70d   :  { %1449 = vpow2.f32 %v1042_v25 }
 0x70e   :  { %v1088_v28 = vpop.permute.xlu0 %1087 }
 0x70f   :  { %v1188_v46 = vadd.f32 %v1925_v4, %v1088_v28  ;;  %v1190_v21 = vadd.f32 %v1927_v27, %v1088_v28 }
 0x716   :  { %v1448_v18 = vpop.eup %1447 }
 0x717   :  { %v1450_v42 = vpop.eup %1449  ;;  %v1044_v17 = vadd.f32 1.0, %v1448_v18 }
 0x718   :  { %v1045_v12 = vadd.f32 1.0, %v1450_v42 }
 0x719   :  { %1451 = vrcp.f32 %v1044_v17 }
 0x71a   :  { %1453 = vrcp.f32 %v1045_v12 }
 0x723   :  { %v1452_v31 = vpop.eup %1451 }
 0x724   :  { %v1454_v10 = vpop.eup %1453  ;;  %v1048_v48 = vmul.f32 %v1452_v31, %v1044_v17 }
 0x725   :  { %v1049_v24 = vmul.f32 %v1454_v10, %v1045_v12 }
 0x726   :  { %v1050_v16 = vsub.f32 2.0, %v1048_v48 }
 0x727   :  { %v1051_v39 = vsub.f32 2.0, %v1049_v24 }
 0x728   :  { %v1052_v43 = vmul.f32 %v1452_v31, %v1050_v16 }
 0x729   :  { %v1053_v30 = vmul.f32 %v1454_v10, %v1051_v39 }
 0x72a   :  { %v1057_v33 = vrot.slane %v1052_v43, %v1056_v26 }
 0x72b   :  { %v1061_v37 = vrot.slane %v1053_v30, %v1056_v26 }
 0x72c   :  { %v1062_v40 = vmul.f32 %v1057_v33, %v1850_v60  ;;  %v1066_v58 = vmul.f32 %v1057_v33, %v1861_v56  ;;  %v1064_v59 = vmul.f32 %v1057_v33, %v1853_v61  ;;  %v1068_v14 = vmul.f32 %v1057_v33, %v1868_v32 }
 0x72d   :  { %v1063_v63 = vmul.f32 %v1061_v37, %v1858_v6  ;;  %v1067_v15 = vmul.f32 %v1061_v37, %v1878_v35  ;;  %v1065_v52 = vmul.f32 %v1061_v37, %v1864_v11  ;;  %v1069_v62 = vmul.f32 %v1061_v37, %v1882_v2 }
 0x72e   :  { %v1192_v4 = vadd.f32 %v1170_v29, %v1062_v40  ;;  %v1196_v27 = vadd.f32 %v1182_v34, %v1066_v58  ;;  %v1194_v47 = vadd.f32 %v1176_v36, %v1064_v59  ;;  %v1198_v60 = vadd.f32 %v1188_v46, %v1068_v14 }
 0x72f   :  { %v1193_v13 = vadd.f32 %v1172_v57, %v1063_v63  ;;  %v1197_v56 = vadd.f32 %v1184_v9, %v1067_v15  ;;  %v1195_v49 = vadd.f32 %v1178_v45, %v1065_v52  ;;  %v1199_v61 = vadd.f32 %v1190_v21, %v1069_v62 }
 0x730   :  { %v1200_v50 = vmax.f32 %v1192_v4, 0.0  ;;  %v1204_v32 = vmax.f32 %v1196_v27, 0.0  ;;  %v1202_v51 = vmax.f32 %v1194_v47, 0.0  ;;  %v1206_v6 = vmax.f32 %v1198_v60, 0.0 }
 0x731   :  { %v1201_v11 = vmax.f32 %v1193_v13, 0.0  ;;  %v1205_v35 = vmax.f32 %v1197_v56, 0.0  ;;  %v1203_v2 = vmax.f32 %v1195_v49, 0.0  ;;  %v1207_v44 = vmax.f32 %v1199_v61, 0.0 }
 0x732   :  { %1208 = vst [vmem:[#allocation5] sm:$0xff] %v1200_v50  ;;  %1212 = vst [vmem:[#allocation5 + $0x20] sm:$0xff] %v1204_v32 }
 0x733   :  { %1210 = vst [vmem:[#allocation5 + $0x10] sm:$0xff] %v1202_v51  ;;  %1214 = vst [vmem:[#allocation5 + $0x30] sm:$0xff] %v1206_v6 }
 0x734   :  { %1209 = vst [vmem:[#allocation5 + $0x8] sm:$0xff] %v1201_v11  ;;  %1213 = vst [vmem:[#allocation5 + $0x28] sm:$0xff] %v1205_v35 }
 0x735   :  { %1211 = vst [vmem:[#allocation5 + $0x18] sm:$0xff] %v1203_v2  ;;  %1215 = vst [vmem:[#allocation5 + $0x38] sm:$0xff] %v1207_v44 }
 0x736   :  { %1478 = shalt.err (!%p1475_p9)
}
 0x737   :  { %s1479_s22 = scalar_lea.hbm %s2069_s8, 1024 }
 0x738   :  { %p1480_p10 = scmp.ne.s32.totalorder %s2069_s8, %s1479_s22  ;;  %p1483_p11 = scmp.lt.u32.totalorder %s1479_s22, %s2069_s8 }
 0x73a   :  { %p1485_p12 = pnand %p1483_p11, %p1480_p10 }
 0x73c   :  { %1488 = shalt.err (!%p1485_p12)
}
 0x73d   :  { %s1508_s27 = smov 256   ;;  %s1509_s6 = smov 16  }
 0x73e   :  { %1227 = dma.vmem_to_hbm [thread:$0]  %s2042_s4, 1024, %s2069_s8, [#allocation3], %s1508_s27, %s1508_s27, %s1509_s6  }
 0x73f   :  { %1491 = dma.done.wait [#allocation3], 1024  }
 0x740   :  { %1492 = vsyncadd [#allocation3], 4294966272 }
 0x741   :  { %1231 = vsyncpa [#allocation3], 1 }
 0x742   :  { %1232 = vsyncpa [#allocation4], 1 }

</bundles_post_ra>
